<compile_context>
chip_gen: v5e
topology: v5e:2x2
jax: 0.10.0
libtpu: 0.0.40
codegen_flags: <defaults>
</compile_context>

<pallas_src>
import functools

import jax
import jax.numpy as jnp
from jax import lax
from jax.experimental import pallas as pl
from jax.experimental.pallas import tpu as pltpu

EPS = 1e-5          # BatchNorm2d default eps
LANE = 128          # TPU lane width


def _round_up(x, m):
    return (x + m - 1) // m * m


def _vmem_limit_bytes():
    """Scoped-VMEM budget: ~half of physical VMEM, clamped to [32, 96] MiB."""
    try:
        cap = int(pltpu.get_tpu_info().vmem_capacity_bytes)
    except Exception:
        return 32 * 1024 * 1024
    return int(min(max(cap // 2, 32 * 1024 * 1024), 96 * 1024 * 1024))


# ---------------------------------------------------------------------------
# Pass 1: per-M-tile partial batch statistics of z = patches @ W (pre-bias).
# Each grid step writes its own (1, 2, OCp) partial [sum; sum-of-squares], so
# there is no cross-tile accumulator and the grid runs fully in parallel.
# ---------------------------------------------------------------------------
def _conv_stats_kernel(p_ref, w_ref, part_ref):
    z = jnp.dot(p_ref[...], w_ref[...], preferred_element_type=jnp.float32)
    s = jnp.sum(z, axis=0, keepdims=True)          # (1, OCp)
    sq = jnp.sum(z * z, axis=0, keepdims=True)     # (1, OCp)
    part_ref[...] = jnp.concatenate([s, sq], axis=0)[None]   # (1, 2, OCp)


# ---------------------------------------------------------------------------
# Pass 2: recompute the matmul and fuse BN (scale/shift) + residual add + ReLU
# into its epilogue.  Avoids the 8 B/elem write+read of a raw f32 y slab.
# ---------------------------------------------------------------------------
def _conv_bn_add_relu_kernel(p_ref, w_ref, ss_ref, r_ref, o_ref):
    z = jnp.dot(p_ref[...], w_ref[...], preferred_element_type=jnp.float32)
    scale = ss_ref[0:1, :]
    shift = ss_ref[1:2, :]
    out = z * scale + shift + r_ref[...]
    o_ref[...] = jnp.maximum(out, 0.0).astype(o_ref.dtype)


# ---------------------------------------------------------------------------
# Plain-JAX glue: im2col (NCHW -> (M, K) patches) and the fused wrapper.
# ---------------------------------------------------------------------------
def _im2col_nchw(x, kh, kw, stride, pad):
    """x: (N, C, H, W) -> patches (N*OH*OW, C*KH*KW), plus OH, OW."""
    n, c, h, w = x.shape
    xp = jnp.pad(x, ((0, 0), (0, 0), (pad, pad), (pad, pad)))
    oh = (h + 2 * pad - kh) // stride + 1
    ow = (w + 2 * pad - kw) // stride + 1
    cols = []
    for i in range(kh):
        for j in range(kw):
            cols.append(
                xp[:, :, i:i + stride * oh:stride, j:j + stride * ow:stride])
    # (N, C, KH*KW, OH, OW) -> (N, OH, OW, C, KH*KW): flattened K axis matches
    # weight.reshape(OC, C*KH*KW).
    patches = jnp.stack(cols, axis=2)
    patches = patches.transpose(0, 3, 4, 1, 2).reshape(n * oh * ow, c * kh * kw)
    return patches, oh, ow


@functools.partial(jax.jit, static_argnames=("stride", "padding", "tm"))
def conv_bn_add_relu_2d(x1, x2, weight, bias, gamma, beta,
                        stride=1, padding=1, tm=512):
    """Fused relu(bn(conv(x1)) + x2).  x1: (N,C,H,W), x2: (N,OC,OH,OW) NCHW."""
    # Conv bias is cancelled exactly by batch-statistics BatchNorm
    # (it shifts the mean by the same per-channel constant), so it never
    # enters the kernels.
    del bias
    n, c, h, w = x1.shape
    oc, _, kh, kw = weight.shape

    # Host-side im2col on the bf16-cast input (halves the im2col slab bytes).
    patches, oh, ow = _im2col_nchw(x1.astype(jnp.bfloat16), kh, kw,
                                   stride, padding)
    m, k = patches.shape

    kp = _round_up(k, LANE)                  # lane-dense K for MXU feeds
    ocp = _round_up(oc, LANE)                # lane-dense output channels
    tm_eff = min(tm, _round_up(m, LANE))     # don't blow tiles past the data
    mp = _round_up(m, tm_eff)
    grid_m = mp // tm_eff

    # bf16 MXU operands; zero padding keeps padded rows / channels exactly 0,
    # so padded rows contribute nothing to the statistics.
    patches_p = jnp.pad(patches, ((0, mp - m), (0, kp - k)))
    w2d = weight.astype(jnp.bfloat16).reshape(oc, c * kh * kw).T      # (K, OC)
    w_p = jnp.pad(w2d, ((0, kp - k), (0, ocp - oc)))

    # Residual in the kernel's (rows, channels) layout (kept f32).
    r2d = x2.transpose(0, 2, 3, 1).reshape(m, oc).astype(jnp.float32)
    r_p = jnp.pad(r2d, ((0, mp - m), (0, ocp - oc)))

    g_p = jnp.pad(gamma.astype(jnp.float32), (0, ocp - oc))
    bt_p = jnp.pad(beta.astype(jnp.float32), (0, ocp - oc))

    cparams = pltpu.CompilerParams(
        dimension_semantics=("parallel",),        # both passes shard over TCs
        vmem_limit_bytes=_vmem_limit_bytes())

    # ---- Pass 1: per-tile partial sums / sums-of-squares --------------------
    partials = pl.pallas_call(
        _conv_stats_kernel,
        out_shape=jax.ShapeDtypeStruct((grid_m, 2, ocp), jnp.float32),
        grid=(grid_m,),
        in_specs=[
            pl.BlockSpec((tm_eff, kp), lambda i: (i, 0)),    # im2col patch tile
            pl.BlockSpec((kp, ocp), lambda i: (0, 0)),       # flattened weight
        ],
        out_specs=pl.BlockSpec((1, 2, ocp), lambda i: (i, 0, 0)),
        compiler_params=cparams,
    )(patches_p, w_p)

    # ---- Finalize BN scale/shift on host (tiny f32 hierarchical reduction) --
    sums = jnp.sum(partials, axis=0)                 # (2, OCp)
    inv_m = 1.0 / float(m)
    mean_z = sums[0] * inv_m
    var = jnp.maximum(sums[1] * inv_m - mean_z * mean_z, 0.0)
    scale = g_p * lax.rsqrt(var + EPS)
    shift = bt_p - scale * mean_z                    # conv bias cancels here
    scale_shift = jnp.stack([scale, shift], axis=0)  # (2, OCp)

    # ---- Pass 2: matmul recompute + fused BN / add / ReLU epilogue ----------
    out_p = pl.pallas_call(
        _conv_bn_add_relu_kernel,
        out_shape=jax.ShapeDtypeStruct((mp, ocp), jnp.float32),
        grid=(grid_m,),
        in_specs=[
            pl.BlockSpec((tm_eff, kp), lambda i: (i, 0)),    # patch tile
            pl.BlockSpec((kp, ocp), lambda i: (0, 0)),       # weight
            pl.BlockSpec((2, ocp), lambda i: (0, 0)),        # [scale; shift]
            pl.BlockSpec((tm_eff, ocp), lambda i: (i, 0)),   # residual
        ],
        out_specs=pl.BlockSpec((tm_eff, ocp), lambda i: (i, 0)),
        input_output_aliases={3: 0},                 # write over residual slab
        compiler_params=cparams,
    )(patches_p, w_p, scale_shift, r_p)

    # Back to NCHW to match the PyTorch module's layout.
    return out_p[:m, :oc].reshape(n, oh, ow, oc).transpose(0, 3, 1, 2)


# ---------------------------------------------------------------------------
# Reference: relu(bn_trainstats(conv(x1) + bias) + x2).  The conv uses the same
# bf16 input precision as the kernel's MXU feed (f32 accumulation) so the
# comparison isolates kernel correctness rather than bf16 rounding.
# ---------------------------------------------------------------------------
def _reference(x1, x2, weight, bias, gamma, beta, stride=1, padding=1):
    y = lax.conv_general_dilated(
        x1.astype(jnp.bfloat16), weight.astype(jnp.bfloat16),
        (stride, stride), [(padding, padding), (padding, padding)],
        dimension_numbers=("NCHW", "OIHW", "NCHW"),
        preferred_element_type=jnp.float32,
    ) + bias.reshape(1, -1, 1, 1)
    mean = jnp.mean(y, axis=(0, 2, 3), keepdims=True)
    var = jnp.mean((y - mean) ** 2, axis=(0, 2, 3), keepdims=True)
    yn = (y - mean) * lax.rsqrt(var + EPS) * gamma.reshape(1, -1, 1, 1) \
        + beta.reshape(1, -1, 1, 1)
    return jnp.maximum(yn + x2, 0.0)


if __name__ == "__main__":
    # Conv2d(4, 8, 3, stride=1, padding=1, bias=True) + BatchNorm2d(8) + add + ReLU
    N, C, H, W = 2, 4, 16, 16
    OC, KH, KW = 8, 3, 3

    key = jax.random.PRNGKey(0)
    kx, kr, kw_, kb, kg, kbeta = jax.random.split(key, 6)
    x1 = jax.random.normal(kx, (N, C, H, W), jnp.float32)
    x2 = jax.random.normal(kr, (N, OC, H, W), jnp.float32)       # residual input
    weight = jax.random.normal(kw_, (OC, C, KH, KW), jnp.float32) * 0.1
    bias = jax.random.normal(kb, (OC,), jnp.float32) * 0.1
    gamma = 1.0 + 0.1 * jax.random.normal(kg, (OC,), jnp.float32)
    beta = 0.1 * jax.random.normal(kbeta, (OC,), jnp.float32)

    out = conv_bn_add_relu_2d(x1, x2, weight, bias, gamma, beta)
    out = jax.block_until_ready(out)

    ref = _reference(x1, x2, weight, bias, gamma, beta)
    assert out.shape == (N, OC, H, W)
    err = float(jnp.max(jnp.abs(out - ref)))
    assert jnp.allclose(out, ref, atol=2e-2, rtol=2e-2), err

    print("KERNEL_OK")
</pallas_src>

<mosaic_0001>
module attributes {stable_mosaic.version = 11 : i64} {
  func.func @_conv_stats_kernel(%arg0: i32, %arg1: memref<512x128xbf16, #tpu.memory_space<vmem>>, %arg2: memref<128x128xbf16, #tpu.memory_space<vmem>>, %arg3: memref<1x2x128xf32, #tpu.memory_space<vmem>>) attributes {dimension_semantics = [#tpu.dimension_semantics<parallel>], iteration_bounds = array<i64: 1>, scalar_prefetch = 0 : i64, scratch_operands = 0 : i64, tpu.core_type = #tpu.core_type<tc>, window_params = [{transform_indices = @transform_0, window_bounds = array<i64: 512, 128>}, {pipeline_mode = #tpu.pipeline_mode<synchronous>, transform_indices = @transform_1, window_bounds = array<i64: 128, 128>}, {transform_indices = @transform_2, window_bounds = array<i64: 1, 2, 128>}]} {
    %c0 = arith.constant 0 : index
    %c0_0 = arith.constant 0 : index
    %0 = vector.load %arg1[%c0, %c0_0] : memref<512x128xbf16, #tpu.memory_space<vmem>>, vector<512x128xbf16>
    %c0_1 = arith.constant 0 : index
    %c0_2 = arith.constant 0 : index
    %1 = vector.load %arg2[%c0_1, %c0_2] : memref<128x128xbf16, #tpu.memory_space<vmem>>, vector<128x128xbf16>
    %cst = arith.constant dense<0.000000e+00> : vector<512x128xf32>
    %2 = tpu.matmul %0, %1, %cst {dimension_numbers = #tpu.dot_dimension_numbers<[1], [0], [0], [1], [0, 0, 1, 1], [], []>} : vector<512x128xbf16>, vector<128x128xbf16>, vector<512x128xf32> -> vector<512x128xf32>
    %cst_3 = arith.constant dense<0.000000e+00> : vector<128xf32>
    %3 = vector.multi_reduction <add>, %2, %cst_3 [0] : vector<512x128xf32> to vector<128xf32>
    %4 = vector.shape_cast %3 : vector<128xf32> to vector<1x128xf32>
    %5 = arith.mulf %2, %2 : vector<512x128xf32>
    %cst_4 = arith.constant dense<0.000000e+00> : vector<128xf32>
    %6 = vector.multi_reduction <add>, %5, %cst_4 [0] : vector<512x128xf32> to vector<128xf32>
    %7 = vector.shape_cast %6 : vector<128xf32> to vector<1x128xf32>
    %8 = tpu.concatenate %4, %7 in 0 : vector<1x128xf32>, vector<1x128xf32> -> vector<2x128xf32>
    %9 = vector.shape_cast %8 : vector<2x128xf32> to vector<1x2x128xf32>
    %c0_5 = arith.constant 0 : index
    %c0_6 = arith.constant 0 : index
    %c0_7 = arith.constant 0 : index
    %10 = vector.load %arg3[%c0_5, %c0_6, %c0_7] : memref<1x2x128xf32, #tpu.memory_space<vmem>>, vector<1x2x128xf32>
    tpu.vector_store %arg3[%c0_5, %c0_6, %c0_7], %9 {strides = array<i32>} : memref<1x2x128xf32, #tpu.memory_space<vmem>>, vector<1x2x128xf32>,
    return
  }
  func.func @transform_0(%arg0: i32) -> (i32, i32) {
    %c0_i32 = arith.constant 0 : i32
    %c0_i32_0 = arith.constant 0 : i32
    return %arg0, %c0_i32 : i32, i32
  }
  func.func @transform_1(%arg0: i32) -> (i32, i32) {
    %c0_i32 = arith.constant 0 : i32
    %c0_i32_0 = arith.constant 0 : i32
    %c0_i32_1 = arith.constant 0 : i32
    return %c0_i32, %c0_i32_0 : i32, i32
  }
  func.func @transform_2(%arg0: i32) -> (i32, i32, i32) {
    %c0_i32 = arith.constant 0 : i32
    %c0_i32_0 = arith.constant 0 : i32
    %c0_i32_1 = arith.constant 0 : i32
    return %arg0, %c0_i32, %c0_i32_0 : i32, i32, i32
  }
}

module attributes {stable_mosaic.version = 11 : i64} {
  func.func @_conv_bn_add_relu_kernel(%arg0: i32, %arg1: memref<512x128xbf16, #tpu.memory_space<vmem>>, %arg2: memref<128x128xbf16, #tpu.memory_space<vmem>>, %arg3: memref<2x128xf32, #tpu.memory_space<vmem>>, %arg4: memref<512x128xf32, #tpu.memory_space<vmem>>, %arg5: memref<512x128xf32, #tpu.memory_space<vmem>>) attributes {dimension_semantics = [#tpu.dimension_semantics<parallel>], iteration_bounds = array<i64: 1>, scalar_prefetch = 0 : i64, scratch_operands = 0 : i64, tpu.core_type = #tpu.core_type<tc>, window_params = [{transform_indices = @transform_0, window_bounds = array<i64: 512, 128>}, {pipeline_mode = #tpu.pipeline_mode<synchronous>, transform_indices = @transform_1, window_bounds = array<i64: 128, 128>}, {pipeline_mode = #tpu.pipeline_mode<synchronous>, transform_indices = @transform_2, window_bounds = array<i64: 2, 128>}, {transform_indices = @transform_3, window_bounds = array<i64: 512, 128>}, {transform_indices = @transform_4, window_bounds = array<i64: 512, 128>}]} {
    %c0 = arith.constant 0 : index
    %c0_0 = arith.constant 0 : index
    %0 = vector.load %arg1[%c0, %c0_0] : memref<512x128xbf16, #tpu.memory_space<vmem>>, vector<512x128xbf16>
    %c0_1 = arith.constant 0 : index
    %c0_2 = arith.constant 0 : index
    %1 = vector.load %arg2[%c0_1, %c0_2] : memref<128x128xbf16, #tpu.memory_space<vmem>>, vector<128x128xbf16>
    %cst = arith.constant dense<0.000000e+00> : vector<512x128xf32>
    %2 = tpu.matmul %0, %1, %cst {dimension_numbers = #tpu.dot_dimension_numbers<[1], [0], [0], [1], [0, 0, 1, 1], [], []>} : vector<512x128xbf16>, vector<128x128xbf16>, vector<512x128xf32> -> vector<512x128xf32>
    %c0_3 = arith.constant 0 : index
    %c0_4 = arith.constant 0 : index
    %3 = vector.load %arg3[%c0_3, %c0_4] : memref<2x128xf32, #tpu.memory_space<vmem>>, vector<1x128xf32>
    %c1 = arith.constant 1 : index
    %c0_5 = arith.constant 0 : index
    %4 = vector.load %arg3[%c1, %c0_5] : memref<2x128xf32, #tpu.memory_space<vmem>>, vector<1x128xf32>
    %5 = vector.broadcast %3 : vector<1x128xf32> to vector<512x128xf32>
    %6 = arith.mulf %2, %5 : vector<512x128xf32>
    %7 = vector.broadcast %4 : vector<1x128xf32> to vector<512x128xf32>
    %8 = arith.addf %6, %7 : vector<512x128xf32>
    %c0_6 = arith.constant 0 : index
    %c0_7 = arith.constant 0 : index
    %9 = vector.load %arg4[%c0_6, %c0_7] : memref<512x128xf32, #tpu.memory_space<vmem>>, vector<512x128xf32>
    %10 = arith.addf %8, %9 : vector<512x128xf32>
    %cst_8 = arith.constant 0.000000e+00 : f32
    %11 = vector.broadcast %cst_8 : f32 to vector<512x128xf32>
    %12 = arith.maximumf %10, %11 : vector<512x128xf32>
    %c0_9 = arith.constant 0 : index
    %c0_10 = arith.constant 0 : index
    %13 = vector.load %arg5[%c0_9, %c0_10] : memref<512x128xf32, #tpu.memory_space<vmem>>, vector<512x128xf32>
    tpu.vector_store %arg5[%c0_9, %c0_10], %12 {strides = array<i32>} : memref<512x128xf32, #tpu.memory_space<vmem>>, vector<512x128xf32>,
    return
  }
  func.func @transform_0(%arg0: i32) -> (i32, i32) {
    %c0_i32 = arith.constant 0 : i32
    %c0_i32_0 = arith.constant 0 : i32
    return %arg0, %c0_i32 : i32, i32
  }
  func.func @transform_1(%arg0: i32) -> (i32, i32) {
    %c0_i32 = arith.constant 0 : i32
    %c0_i32_0 = arith.constant 0 : i32
    %c0_i32_1 = arith.constant 0 : i32
    return %c0_i32, %c0_i32_0 : i32, i32
  }
  func.func @transform_2(%arg0: i32) -> (i32, i32) {
    %c0_i32 = arith.constant 0 : i32
    %c0_i32_0 = arith.constant 0 : i32
    %c0_i32_1 = arith.constant 0 : i32
    return %c0_i32, %c0_i32_0 : i32, i32
  }
  func.func @transform_3(%arg0: i32) -> (i32, i32) {
    %c0_i32 = arith.constant 0 : i32
    %c0_i32_0 = arith.constant 0 : i32
    return %arg0, %c0_i32 : i32, i32
  }
  func.func @transform_4(%arg0: i32) -> (i32, i32) {
    %c0_i32 = arith.constant 0 : i32
    %c0_i32_0 = arith.constant 0 : i32
    return %arg0, %c0_i32 : i32, i32
  }
}

</mosaic_0001>

<bundles_post_ra>
// kernel: conv_bn_add_relu_2d.2
= control target key start
LH: loop header
LB: loop body
LE: loop exit
PB: predicated region body
PF: predicated region fallthrough
CT: control target
= control target key end

     0   :  { %vm702_vm0 = vcmask 1040384   ;;  %s1241_s1 = inlined_call_operand.vmem [shape: bf16[128,128], index: 1, kind: input, shape index: {}]   ;;  %s1242_s0 = inlined_call_operand.vmem [shape: bf16[512,128], index: 0, kind: input, shape index: {}]   ;;  %s1243_s2 = inlined_call_operand.vmem [shape: f32[1,2,128], index: 2, kind: output, shape index: {}]  }
   0x1   :  { %v908_v0 = vld [vmem:[%s1241_s1 + $0x38] sm:$0xff]  ;;  %v907_v1 = vld [vmem:[%s1241_s1 + $0x30] sm:$0xff]  ;;  %v906_v2 = vld [vmem:[%s1241_s1 + $0x28] sm:$0xff] }
   0x2   :  { %331 = vmatpush.bf16.msra.mxu0 %v908_v0  ;;  %909 = vmatpush.bf16.msra.mxu1 %v908_v0  ;;  %v905_v3 = vld [vmem:[%s1241_s1 + $0x20] sm:$0xff]  ;;  %v904_v4 = vld [vmem:[%s1241_s1 + $0x18] sm:$0xff]  ;;  %v903_v5 = vld [vmem:[%s1241_s1 + $0x10] sm:$0xff] }
   0x3   :  { %910 = vmatpush.bf16.msra.mxu2 %v908_v0  ;;  %911 = vmatpush.bf16.msra.mxu3 %v908_v0  ;;  %v902_v6 = vld [vmem:[%s1241_s1 + $0x8] sm:$0xff]  ;;  %v901_v7 = vld [vmem:[%s1241_s1] sm:$0xff]  ;;  %v871_v13 = vld [vmem:[%s1242_s0 + $0x10] sm:$0xff] }
   0x4   :  { %v869_v8 = vld [vmem:[%s1242_s0] sm:$0xff]  ;;  %v870_v10 = vld [vmem:[%s1242_s0 + $0x8] sm:$0xff]  ;;  %v879_v14 = vld [vmem:[%s1242_s0 + $0x50] sm:$0xff] }
   0x5   :  { %v877_v9 = vld [vmem:[%s1242_s0 + $0x40] sm:$0xff]  ;;  %v878_v11 = vld [vmem:[%s1242_s0 + $0x48] sm:$0xff]  ;;  %v872_v16 = vld [vmem:[%s1242_s0 + $0x18] sm:$0xff] }
   0x6   :  { %332 = vmatpush.bf16.msra.mxu0 %v907_v1  ;;  %912 = vmatpush.bf16.msra.mxu1 %v907_v1  ;;  %v885_v12 = vld [vmem:[%s1242_s0 + $0x80] sm:$0xff]  ;;  %v886_v15 = vld [vmem:[%s1242_s0 + $0x88] sm:$0xff]  ;;  %v880_v17 = vld [vmem:[%s1242_s0 + $0x58] sm:$0xff] }
   0x7   :  { %913 = vmatpush.bf16.msra.mxu2 %v907_v1  ;;  %914 = vmatpush.bf16.msra.mxu3 %v907_v1  ;;  %v887_v18 = vld [vmem:[%s1242_s0 + $0x90] sm:$0xff]  ;;  %v893_v19 = vld [vmem:[%s1242_s0 + $0xc0] sm:$0xff]  ;;  %v888_v22 = vld [vmem:[%s1242_s0 + $0x98] sm:$0xff] }
   0x8   :  { %v873_v20 = vld [vmem:[%s1242_s0 + $0x20] sm:$0xff]  ;;  %v894_v23 = vld [vmem:[%s1242_s0 + $0xc8] sm:$0xff]  ;;  %v895_v27 = vld [vmem:[%s1242_s0 + $0xd0] sm:$0xff] }
   0x9   :  { %v881_v21 = vld [vmem:[%s1242_s0 + $0x60] sm:$0xff]  ;;  %v874_v24 = vld [vmem:[%s1242_s0 + $0x28] sm:$0xff]  ;;  %v875_v28 = vld [vmem:[%s1242_s0 + $0x30] sm:$0xff] }
   0xa   :  { %333 = vmatpush.bf16.msra.mxu0 %v906_v2  ;;  %915 = vmatpush.bf16.msra.mxu1 %v906_v2  ;;  %v882_v25 = vld [vmem:[%s1242_s0 + $0x68] sm:$0xff]  ;;  %v889_v26 = vld [vmem:[%s1242_s0 + $0xa0] sm:$0xff]  ;;  %v883_v29 = vld [vmem:[%s1242_s0 + $0x70] sm:$0xff] }
   0xb   :  { %916 = vmatpush.bf16.msra.mxu2 %v906_v2  ;;  %917 = vmatpush.bf16.msra.mxu3 %v906_v2  ;;  %v890_v30 = vld [vmem:[%s1242_s0 + $0xa8] sm:$0xff]  ;;  %v896_v31 = vld [vmem:[%s1242_s0 + $0xd8] sm:$0xff]  ;;  %v891_v34 = vld [vmem:[%s1242_s0 + $0xb0] sm:$0xff] }
   0xc   :  { %v876_v32 = vld [vmem:[%s1242_s0 + $0x38] sm:$0xff]  ;;  %v897_v35 = vld [vmem:[%s1242_s0 + $0xe0] sm:$0xff]  ;;  %v898_v39 = vld [vmem:[%s1242_s0 + $0xe8] sm:$0xff] }
   0xd   :  { %v884_v33 = vld [vmem:[%s1242_s0 + $0x78] sm:$0xff]  ;;  %v899_v50 = vld [vmem:[%s1242_s0 + $0xf0] sm:$0xff] }
   0xe   :  { %334 = vmatpush.bf16.msra.mxu0 %v905_v3  ;;  %918 = vmatpush.bf16.msra.mxu1 %v905_v3  ;;  %v892_v38 = vld [vmem:[%s1242_s0 + $0xb8] sm:$0xff] }
   0xf   :  { %919 = vmatpush.bf16.msra.mxu2 %v905_v3  ;;  %920 = vmatpush.bf16.msra.mxu3 %v905_v3  ;;  %v900_v62 = vld [vmem:[%s1242_s0 + $0xf8] sm:$0xff] }
  0x12   :  { %335 = vmatpush.bf16.msra.mxu0 %v904_v4  ;;  %921 = vmatpush.bf16.msra.mxu1 %v904_v4 }
  0x13   :  { %922 = vmatpush.bf16.msra.mxu2 %v904_v4  ;;  %923 = vmatpush.bf16.msra.mxu3 %v904_v4 }
  0x16   :  { %336 = vmatpush.bf16.msra.mxu0 %v903_v5  ;;  %924 = vmatpush.bf16.msra.mxu1 %v903_v5 }
  0x17   :  { %925 = vmatpush.bf16.msra.mxu2 %v903_v5  ;;  %926 = vmatpush.bf16.msra.mxu3 %v903_v5 }
  0x1a   :  { %337 = vmatpush.bf16.msra.mxu0 %v902_v6  ;;  %927 = vmatpush.bf16.msra.mxu1 %v902_v6 }
  0x1b   :  { %928 = vmatpush.bf16.msra.mxu2 %v902_v6  ;;  %929 = vmatpush.bf16.msra.mxu3 %v902_v6 }
  0x1e   :  { %338 = vmatpush.bf16.msra.mxu0 %v901_v7  ;;  %930 = vmatpush.bf16.msra.mxu1 %v901_v7 }
  0x1f   :  { %931 = vmatpush.bf16.msra.mxu2 %v901_v7  ;;  %932 = vmatpush.bf16.msra.mxu3 %v901_v7 }
  0x21   :  { %339 = vmatmul.bf16.vlgmr.msra.gmra.mxu0 %v869_v8  ;;  %379 = vmatmul.bf16.vlgmr.msra.gmra.mxu1 %v877_v9 }
  0x22   :  { %419 = vmatmul.bf16.vlgmr.msra.gmra.mxu2 %v885_v12  ;;  %459 = vmatmul.bf16.vlgmr.msra.gmra.mxu3 %v893_v19 }
  0x31   :  { %344 = vmatmul.bf16.gmra.mxu0 %v870_v10  ;;  %384 = vmatmul.bf16.gmra.mxu1 %v878_v11 }
  0x32   :  { %424 = vmatmul.bf16.gmra.mxu2 %v886_v15  ;;  %464 = vmatmul.bf16.gmra.mxu3 %v894_v23 }
  0x41   :  { %349 = vmatmul.bf16.gmra.mxu0 %v871_v13  ;;  %389 = vmatmul.bf16.gmra.mxu1 %v879_v14 }
  0x42   :  { %429 = vmatmul.bf16.gmra.mxu2 %v887_v18  ;;  %469 = vmatmul.bf16.gmra.mxu3 %v895_v27 }
  0x51   :  { %354 = vmatmul.bf16.gmra.mxu0 %v872_v16  ;;  %394 = vmatmul.bf16.gmra.mxu1 %v880_v17 }
  0x52   :  { %434 = vmatmul.bf16.gmra.mxu2 %v888_v22  ;;  %474 = vmatmul.bf16.gmra.mxu3 %v896_v31 }
  0x61   :  { %359 = vmatmul.bf16.gmra.mxu0 %v873_v20  ;;  %399 = vmatmul.bf16.gmra.mxu1 %v881_v21 }
  0x62   :  { %439 = vmatmul.bf16.gmra.mxu2 %v889_v26  ;;  %479 = vmatmul.bf16.gmra.mxu3 %v897_v35 }
  0x71   :  { %364 = vmatmul.bf16.gmra.mxu0 %v874_v24  ;;  %404 = vmatmul.bf16.gmra.mxu1 %v882_v25 }
  0x72   :  { %444 = vmatmul.bf16.gmra.mxu2 %v890_v30  ;;  %484 = vmatmul.bf16.gmra.mxu3 %v898_v39 }
  0x81   :  { %369 = vmatmul.bf16.gmra.mxu0 %v875_v28  ;;  %409 = vmatmul.bf16.gmra.mxu1 %v883_v29 }
  0x82   :  { %449 = vmatmul.bf16.gmra.mxu2 %v891_v34  ;;  %489 = vmatmul.bf16.gmra.mxu3 %v899_v50 }
  0x91   :  { %374 = vmatmul.bf16.gmra.mxu0 %v876_v32  ;;  %414 = vmatmul.bf16.gmra.mxu1 %v884_v33 }
  0x92   :  { %454 = vmatmul.bf16.gmra.mxu2 %v892_v38  ;;  %494 = vmatmul.bf16.gmra.mxu3 %v900_v62 }
  0x9e   :  { %v340_v36 = vpop.f32.mrf.mxu0  ;;  %v1056_v37 = vpop.f32.mrf.mxu1 }
  0x9f   :  { %v569_v41 = vmul.f32 %v340_v36, %v340_v36 }
  0xa5   :  { %v1073_v58 = vpop.f32.mrf.mxu2  ;;  %v1090_v9 = vpop.f32.mrf.mxu3 }
  0xa6   :  { %v342_v40 = vpop.f32.mrf.mxu0  ;;  %v1064_v44 = vpop.f32.mrf.mxu1 }
  0xa7   :  { %v500_v42 = vadd.f32 %v342_v40, %v340_v36  ;;  %v570_v43 = vmul.f32 %v342_v40, %v342_v40 }
  0xa9   :  { %v633_v45 = vadd.f32 %v570_v43, %v569_v41 }
  0xad   :  { %v1080_v1 = vpop.f32.mrf.mxu2  ;;  %v1096_v13 = vpop.f32.mrf.mxu3 }
  0xae   :  { %v345_v46 = vpop.f32.mrf.mxu0  ;;  %v1069_v51 = vpop.f32.mrf.mxu1 }
  0xaf   :  { %v501_v47 = vadd.f32 %v500_v42, %v345_v46  ;;  %v571_v48 = vmul.f32 %v345_v46, %v345_v46 }
  0xb1   :  { %v634_v49 = vadd.f32 %v633_v45, %v571_v48 }
  0xb5   :  { %v1084_v4 = vpop.f32.mrf.mxu2  ;;  %v1102_v17 = vpop.f32.mrf.mxu3 }
  0xb6   :  { %v347_v52 = vpop.f32.mrf.mxu0  ;;  %v1071_v56 = vpop.f32.mrf.mxu1 }
  0xb7   :  { %v502_v53 = vadd.f32 %v501_v47, %v347_v52  ;;  %v572_v54 = vmul.f32 %v347_v52, %v347_v52 }
  0xb9   :  { %v635_v55 = vadd.f32 %v634_v49, %v572_v54 }
  0xbd   :  { %v1088_v7 = vpop.f32.mrf.mxu2  ;;  %v1108_v21 = vpop.f32.mrf.mxu3 }
  0xbe   :  { %v350_v57 = vpop.f32.mrf.mxu0  ;;  %v1078_v0 = vpop.f32.mrf.mxu1 }
  0xbf   :  { %v503_v59 = vadd.f32 %v502_v53, %v350_v57  ;;  %v573_v60 = vmul.f32 %v350_v57, %v350_v57 }
  0xc1   :  { %v636_v61 = vadd.f32 %v635_v55, %v573_v60 }
  0xc5   :  { %v1094_v12 = vpop.f32.mrf.mxu2  ;;  %v1114_v32 = vpop.f32.mrf.mxu3 }
  0xc6   :  { %v352_v63 = vpop.f32.mrf.mxu0  ;;  %v1082_v3 = vpop.f32.mrf.mxu1 }
  0xc7   :  { %v574_v23 = vmul.f32 %v352_v63, %v352_v63  ;;  %v504_v25 = vadd.f32 %v503_v59, %v352_v63 }
  0xc9   :  { %v637_v28 = vadd.f32 %v636_v61, %v574_v23 }
  0xcd   :  { %v1100_v16 = vpop.f32.mrf.mxu2  ;;  %v1120_v54 = vpop.f32.mrf.mxu3 }
  0xce   :  { %v355_v2 = vpop.f32.mrf.mxu0  ;;  %v1086_v6 = vpop.f32.mrf.mxu1 }
  0xcf   :  { %v575_v26 = vmul.f32 %v355_v2, %v355_v2  ;;  %v505_v29 = vadd.f32 %v504_v25, %v355_v2 }
  0xd1   :  { %v638_v33 = vadd.f32 %v637_v28, %v575_v26 }
  0xd5   :  { %v1106_v20 = vpop.f32.mrf.mxu2 }
  0xd6   :  { %v357_v5 = vpop.f32.mrf.mxu0  ;;  %v1092_v10 = vpop.f32.mrf.mxu1 }
  0xd7   :  { %v576_v30 = vmul.f32 %v357_v5, %v357_v5  ;;  %v506_v34 = vadd.f32 %v505_v29, %v357_v5  ;;  %v586_v29 = vmul.f32 %v1064_v44, %v1064_v44 }
  0xd9   :  { %v639_v36 = vadd.f32 %v638_v33, %v576_v30  ;;  %v587_v33 = vmul.f32 %v1069_v51, %v1069_v51 }
  0xdd   :  { %v1112_v27 = vpop.f32.mrf.mxu2 }
  0xde   :  { %v360_v8 = vpop.f32.mrf.mxu0  ;;  %v1098_v15 = vpop.f32.mrf.mxu1 }
  0xdf   :  { %v577_v35 = vmul.f32 %v360_v8, %v360_v8  ;;  %v507_v38 = vadd.f32 %v506_v34, %v360_v8 }
  0xe1   :  { %v640_v40 = vadd.f32 %v639_v36, %v577_v35  ;;  %v588_v36 = vmul.f32 %v1071_v56, %v1071_v56 }
  0xe5   :  { %v1118_v49 = vpop.f32.mrf.mxu2 }
  0xe6   :  { %v362_v11 = vpop.f32.mrf.mxu0  ;;  %v1104_v19 = vpop.f32.mrf.mxu1 }
  0xe7   :  { %v578_v39 = vmul.f32 %v362_v11, %v362_v11  ;;  %v508_v41 = vadd.f32 %v507_v38, %v362_v11 }
  0xe9   :  { %v641_v45 = vadd.f32 %v640_v40, %v578_v39  ;;  %v589_v40 = vmul.f32 %v1078_v0, %v1078_v0 }
  0xed   :  { %v1122_v25 = vpop.f32.mrf.mxu2 }
  0xee   :  { %v365_v14 = vpop.f32.mrf.mxu0  ;;  %v1110_v24 = vpop.f32.mrf.mxu1 }
  0xef   :  { %v579_v42 = vmul.f32 %v365_v14, %v365_v14  ;;  %v509_v46 = vadd.f32 %v508_v41, %v365_v14 }
  0xf1   :  { %v642_v50 = vadd.f32 %v641_v45, %v579_v42  ;;  %v590_v45 = vmul.f32 %v1082_v3, %v1082_v3 }
  0xf5   :  { %v1141_v42 = vpop.f32.mrf.mxu2 }
  0xf6   :  { %v367_v18 = vpop.f32.mrf.mxu0  ;;  %v1116_v43 = vpop.f32.mrf.mxu1 }
  0xf7   :  { %v580_v47 = vmul.f32 %v367_v18, %v367_v18  ;;  %v510_v52 = vadd.f32 %v509_v46, %v367_v18  ;;  %v585_v18 = vmul.f32 %v1056_v37, %v1056_v37 }
  0xf9   :  { %v643_v55 = vadd.f32 %v642_v50, %v580_v47 }
  0xfe   :  { %v370_v22 = vpop.f32.mrf.mxu0  ;;  %v410_v8 = vpop.f32.mrf.mxu1 }
  0xff   :  { %v581_v53 = vmul.f32 %v370_v22, %v370_v22  ;;  %v511_v57 = vadd.f32 %v510_v52, %v370_v22  ;;  %v1127_v22 = vpop.f32.mrf.mxu3 }
 0x101   :  { %v644_v60 = vadd.f32 %v643_v55, %v581_v53  ;;  %v593_v55 = vmul.f32 %v1098_v15, %v1098_v15 }
 0x106   :  { %v372_v31 = vpop.f32.mrf.mxu0  ;;  %v412_v39 = vpop.f32.mrf.mxu1 }
 0x107   :  { %v582_v59 = vmul.f32 %v372_v31, %v372_v31  ;;  %v512_v61 = vadd.f32 %v511_v57, %v372_v31  ;;  %v1146_v47 = vpop.f32.mrf.mxu3 }
 0x109   :  { %v645_v63 = vadd.f32 %v644_v60, %v582_v59  ;;  %v594_v60 = vmul.f32 %v1104_v19, %v1104_v19 }
 0x10e   :  { %v375_v48 = vpop.f32.mrf.mxu0  ;;  %v415_v59 = vpop.f32.mrf.mxu1 }
 0x10f   :  { %v583_v62 = vmul.f32 %v375_v48, %v375_v48  ;;  %v513_v2 = vadd.f32 %v512_v61, %v375_v48 }
 0x111   :  { %v646_v11 = vadd.f32 %v645_v63, %v583_v62  ;;  %v595_v63 = vmul.f32 %v1110_v24, %v1110_v24 }
 0x116   :  { %v377_v5 = vpop.f32.mrf.mxu0 }
 0x117   :  { %v514_v14 = vadd.f32 %v513_v2, %v377_v5  ;;  %v584_v23 = vmul.f32 %v377_v5, %v377_v5  ;;  %v1163_v5 = vpop.f32.mrf.mxu3 }
 0x119   :  { %v515_v26 = vadd.f32 %v514_v14, %v1056_v37  ;;  %v647_v28 = vadd.f32 %v646_v11, %v584_v23 }
 0x11b   :  { %v516_v30 = vadd.f32 %v515_v26, %v1064_v44  ;;  %v648_v31 = vadd.f32 %v647_v28, %v585_v18  ;;  %v597_v18 = vmul.f32 %v410_v8, %v410_v8 }
 0x11d   :  { %v517_v34 = vadd.f32 %v516_v30, %v1069_v51  ;;  %v649_v35 = vadd.f32 %v648_v31, %v586_v29  ;;  %v598_v29 = vmul.f32 %v412_v39, %v412_v39  ;;  %v417_v30 = vpop.f32.mrf.mxu1 }
 0x11f   :  { %v518_v37 = vadd.f32 %v517_v34, %v1071_v56  ;;  %v650_v38 = vadd.f32 %v649_v35, %v587_v33  ;;  %v591_v56 = vmul.f32 %v1086_v6, %v1086_v6  ;;  %v599_v34 = vmul.f32 %v415_v59, %v415_v59 }
 0x121   :  { %v519_v41 = vadd.f32 %v518_v37, %v1078_v0  ;;  %v651_v44 = vadd.f32 %v650_v38, %v588_v36  ;;  %v592_v0 = vmul.f32 %v1092_v10, %v1092_v10  ;;  %v600_v37 = vmul.f32 %v417_v30, %v417_v30  ;;  %v1168_v38 = vpop.f32.mrf.mxu3 }
 0x123   :  { %v520_v51 = vadd.f32 %v519_v41, %v1082_v3  ;;  %v652_v46 = vadd.f32 %v651_v44, %v589_v40  ;;  %v602_v41 = vmul.f32 %v1080_v1, %v1080_v1 }
 0x125   :  { %v653_v48 = vadd.f32 %v652_v46, %v590_v45  ;;  %v521_v50 = vadd.f32 %v520_v51, %v1086_v6  ;;  %v447_v6 = vpop.f32.mrf.mxu2  ;;  %v603_v45 = vmul.f32 %v1084_v4, %v1084_v4 }
 0x127   :  { %v522_v52 = vadd.f32 %v521_v50, %v1092_v10  ;;  %v654_v53 = vadd.f32 %v653_v48, %v591_v56  ;;  %v604_v56 = vmul.f32 %v1088_v7, %v1088_v7 }
 0x129   :  { %v523_v3 = vadd.f32 %v522_v52, %v1098_v15  ;;  %v655_v57 = vadd.f32 %v654_v53, %v592_v0  ;;  %v596_v15 = vmul.f32 %v1116_v43, %v1116_v43  ;;  %v605_v0 = vmul.f32 %v1094_v12, %v1094_v12  ;;  %v1185_v53 = vpop.f32.mrf.mxu3 }
 0x12b   :  { %v524_v61 = vadd.f32 %v523_v3, %v1104_v19  ;;  %v656_v62 = vadd.f32 %v655_v57, %v593_v55  ;;  %v606_v55 = vmul.f32 %v1100_v16, %v1100_v16  ;;  %v607_v57 = vmul.f32 %v1106_v20, %v1106_v20 }
 0x12d   :  { %v525_v10 = vadd.f32 %v524_v61, %v1110_v24  ;;  %v657_v2 = vadd.f32 %v656_v62, %v594_v60  ;;  %v450_v24 = vpop.f32.mrf.mxu2  ;;  %v608_v60 = vmul.f32 %v1112_v27, %v1112_v27  ;;  %v609_v62 = vmul.f32 %v1118_v49, %v1118_v49 }
 0x12f   :  { %v526_v11 = vadd.f32 %v525_v10, %v1116_v43  ;;  %v658_v14 = vadd.f32 %v657_v2, %v595_v63  ;;  %v601_v43 = vmul.f32 %v1073_v58, %v1073_v58  ;;  %v610_v2 = vmul.f32 %v1122_v25, %v1122_v25 }
 0x131   :  { %v527_v23 = vadd.f32 %v526_v11, %v410_v8  ;;  %v659_v26 = vadd.f32 %v658_v14, %v596_v15  ;;  %v611_v14 = vmul.f32 %v1141_v42, %v1141_v42 }
 0x133   :  { %v660_v19 = vadd.f32 %v659_v26, %v597_v18  ;;  %v528_v28 = vadd.f32 %v527_v23, %v412_v39  ;;  %v612_v26 = vmul.f32 %v447_v6, %v447_v6 }
 0x135   :  { %v661_v31 = vadd.f32 %v660_v19, %v598_v29  ;;  %v529_v33 = vadd.f32 %v528_v28, %v415_v59  ;;  %v613_v29 = vmul.f32 %v450_v24, %v450_v24 }
 0x137   :  { %v662_v35 = vadd.f32 %v661_v31, %v599_v34  ;;  %v530_v36 = vadd.f32 %v529_v33, %v417_v30 }
 0x139   :  { %v531_v40 = vadd.f32 %v530_v36, %v1073_v58  ;;  %v663_v8 = vadd.f32 %v662_v35, %v600_v37  ;;  %v452_v58 = vpop.f32.mrf.mxu2 }
 0x13a   :  { %v614_v33 = vmul.f32 %v452_v58, %v452_v58 }
 0x13b   :  { %v532_v39 = vadd.f32 %v531_v40, %v1080_v1  ;;  %v664_v44 = vadd.f32 %v663_v8, %v601_v43 }
 0x13d   :  { %v533_v51 = vadd.f32 %v532_v39, %v1084_v4  ;;  %v665_v46 = vadd.f32 %v664_v44, %v602_v41 }
 0x13f   :  { %v534_v48 = vadd.f32 %v533_v51, %v1088_v7  ;;  %v666_v50 = vadd.f32 %v665_v46, %v603_v45  ;;  %v619_v45 = vmul.f32 %v1102_v17, %v1102_v17 }
 0x141   :  { %v535_v52 = vadd.f32 %v534_v48, %v1094_v12  ;;  %v667_v1 = vadd.f32 %v666_v50, %v604_v56  ;;  %v620_v56 = vmul.f32 %v1108_v21, %v1108_v21 }
 0x143   :  { %v536_v4 = vadd.f32 %v535_v52, %v1100_v16  ;;  %v668_v3 = vadd.f32 %v667_v1, %v605_v0  ;;  %v455_v16 = vpop.f32.mrf.mxu2  ;;  %v622_v52 = vmul.f32 %v1120_v54, %v1120_v54 }
 0x144   :  { %v615_v36 = vmul.f32 %v455_v16, %v455_v16 }
 0x145   :  { %v669_v7 = vadd.f32 %v668_v3, %v606_v55  ;;  %v537_v59 = vadd.f32 %v536_v4, %v1106_v20  ;;  %v487_v20 = vpop.f32.mrf.mxu3  ;;  %v623_v55 = vmul.f32 %v1127_v22, %v1127_v22  ;;  %v624_v3 = vmul.f32 %v1146_v47, %v1146_v47 }
 0x147   :  { %v538_v12 = vadd.f32 %v537_v59, %v1112_v27  ;;  %v670_v61 = vadd.f32 %v669_v7, %v607_v57 }
 0x149   :  { %v539_v63 = vadd.f32 %v538_v12, %v1118_v49  ;;  %v671_v10 = vadd.f32 %v670_v61, %v608_v60  ;;  %v626_v12 = vmul.f32 %v1168_v38, %v1168_v38 }
 0x14b   :  { %v540_v15 = vadd.f32 %v539_v63, %v1122_v25  ;;  %v672_v11 = vadd.f32 %v671_v10, %v609_v62  ;;  %v457_v34 = vpop.f32.mrf.mxu2 }
 0x14c   :  { %v616_v8 = vmul.f32 %v457_v34, %v457_v34 }
 0x14d   :  { %v541_v27 = vadd.f32 %v540_v15, %v1141_v42  ;;  %v673_v23 = vadd.f32 %v672_v11, %v610_v2  ;;  %v490_v37 = vpop.f32.mrf.mxu3  ;;  %v617_v42 = vmul.f32 %v1090_v9, %v1090_v9 }
 0x14f   :  { %v542_v18 = vadd.f32 %v541_v27, %v447_v6  ;;  %v674_v19 = vadd.f32 %v673_v23, %v611_v14 }
 0x151   :  { %v675_v28 = vadd.f32 %v674_v19, %v612_v26  ;;  %v543_v49 = vadd.f32 %v542_v18, %v450_v24  ;;  %v618_v24 = vmul.f32 %v1096_v13, %v1096_v13 }
 0x153   :  { %v676_v30 = vadd.f32 %v675_v28, %v613_v29  ;;  %v544_v31 = vadd.f32 %v543_v49, %v452_v58  ;;  %v621_v58 = vmul.f32 %v1114_v32, %v1114_v32 }
 0x155   :  { %v677_v35 = vadd.f32 %v676_v30, %v614_v33  ;;  %v545_v25 = vadd.f32 %v544_v31, %v455_v16  ;;  %v628_v16 = vmul.f32 %v487_v20, %v487_v20 }
 0x157   :  { %v678_v43 = vadd.f32 %v677_v35, %v615_v36  ;;  %v546_v40 = vadd.f32 %v545_v25, %v457_v34 }
 0x159   :  { %v547_v6 = vadd.f32 %v546_v40, %v1090_v9  ;;  %v679_v41 = vadd.f32 %v678_v43, %v616_v8  ;;  %v492_v9 = vpop.f32.mrf.mxu3 }
 0x15a   :  { %v630_v23 = vmul.f32 %v492_v9, %v492_v9 }
 0x15b   :  { %v548_v39 = vadd.f32 %v547_v6, %v1096_v13  ;;  %v680_v44 = vadd.f32 %v679_v41, %v617_v42 }
 0x15d   :  { %v549_v51 = vadd.f32 %v548_v39, %v1102_v17  ;;  %v681_v46 = vadd.f32 %v680_v44, %v618_v24 }
 0x15f   :  { %v550_v48 = vadd.f32 %v549_v51, %v1108_v21  ;;  %v682_v50 = vadd.f32 %v681_v46, %v619_v45 }
 0x161   :  { %v551_v0 = vadd.f32 %v550_v48, %v1114_v32  ;;  %v683_v13 = vadd.f32 %v682_v50, %v620_v56  ;;  %v625_v32 = vmul.f32 %v1163_v5, %v1163_v5 }
 0x163   :  { %v552_v1 = vadd.f32 %v551_v0, %v1120_v54  ;;  %v684_v17 = vadd.f32 %v683_v13, %v621_v58  ;;  %v495_v54 = vpop.f32.mrf.mxu3 }
 0x165   :  { %v685_v4 = vadd.f32 %v684_v17, %v622_v52  ;;  %v553_v21 = vadd.f32 %v552_v1, %v1127_v22  ;;  %v627_v22 = vmul.f32 %v1185_v53, %v1185_v53 }
 0x167   :  { %v554_v57 = vadd.f32 %v553_v21, %v1146_v47  ;;  %v686_v7 = vadd.f32 %v685_v4, %v623_v55 }
 0x169   :  { %v555_v59 = vadd.f32 %v554_v57, %v1163_v5  ;;  %v687_v60 = vadd.f32 %v686_v7, %v624_v3  ;;  %v629_v5 = vmul.f32 %v490_v37, %v490_v37 }
 0x16b   :  { %v556_v61 = vadd.f32 %v555_v59, %v1168_v38  ;;  %v688_v62 = vadd.f32 %v687_v60, %v625_v32  ;;  %v497_v18 = vpop.f32.mrf.mxu3  ;;  %v631_v38 = vmul.f32 %v495_v54, %v495_v54 }
 0x16c   :  { %v632_v29 = vmul.f32 %v497_v18, %v497_v18 }
 0x16d   :  { %v557_v63 = vadd.f32 %v556_v61, %v1185_v53  ;;  %v689_v47 = vadd.f32 %v688_v62, %v626_v12 }
 0x16f   :  { %v558_v10 = vadd.f32 %v557_v63, %v487_v20  ;;  %v690_v2 = vadd.f32 %v689_v47, %v627_v22 }
 0x171   :  { %v691_v15 = vadd.f32 %v690_v2, %v628_v16  ;;  %v559_v11 = vadd.f32 %v558_v10, %v490_v37 }
 0x173   :  { %v692_v14 = vadd.f32 %v691_v15, %v629_v5  ;;  %v560_v27 = vadd.f32 %v559_v11, %v492_v9 }
 0x175   :  { %v693_v26 = vadd.f32 %v692_v14, %v630_v23  ;;  %v561_v19 = vadd.f32 %v560_v27, %v495_v54 }
 0x177   :  { %v694_v28 = vadd.f32 %v693_v26, %v631_v38  ;;  %v562_v49 = vadd.f32 %v561_v19, %v497_v18 }
 0x179   :  { %v563_v30 = vrot.slane %v562_v49, 4  ;;  %v695_v31 = vadd.f32 %v694_v28, %v632_v29 }
 0x17b   :  { %v564_v53 = vadd.f32 %v563_v30, %v562_v49  ;;  %v696_v33 = vrot.slane %v695_v31, 4 }
 0x17d   :  { %v565_v34 = vrot.slane %v564_v53, 2  ;;  %v697_v20 = vadd.f32 %v696_v33, %v695_v31 }
 0x17f   :  { %v566_v35 = vadd.f32 %v565_v34, %v564_v53  ;;  %v698_v25 = vrot.slane %v697_v20, 2 }
 0x181   :  { %v567_v36 = vrot.slane %v566_v35, 1  ;;  %v699_v37 = vadd.f32 %v698_v25, %v697_v20 }
 0x183   :  { %v700_v43 = vrot.slane %v699_v37, 1  ;;  %v568_v40 = vadd.f32 %v567_v36, %v566_v35 }
 0x185   :  { %v701_v8 = vadd.f32 %v700_v43, %v699_v37 }
 0x187   :  { %v703_v42 = vsel %vm702_vm0, %v568_v40, %v701_v8 }
 0x188   :  { %704 = vst [vmem:[%s1243_s2] sm:$0x3] %v703_v42 }

// kernel: conv_bn_add_relu_2d.3
= control target key start
LH: loop header
LB: loop body
LE: loop exit
PB: predicated region body
PF: predicated region fallthrough
CT: control target
= control target key end

     0   :  { %s1791_s1 = inlined_call_operand.vmem [shape: bf16[128,128], index: 1, kind: input, shape index: {}]   ;;  %s1792_s2 = inlined_call_operand.vmem [shape: f32[2,128], index: 2, kind: input, shape index: {}]   ;;  %s1793_s0 = inlined_call_operand.vmem [shape: bf16[512,128], index: 0, kind: input, shape index: {}]   ;;  %s1794_s3 = inlined_call_operand.vmem [shape: f32[512,128], index: 3, kind: input, shape index: {}, may-alias: {3,4}]   ;;  %s1795_s4 = inlined_call_operand.vmem [shape: f32[512,128], index: 4, kind: output, shape index: {}, may-alias: {3,4}]  }
   0x1   :  { %v1097_v0 = vld [vmem:[%s1791_s1 + $0x38] sm:$0xff]  ;;  %v1096_v1 = vld [vmem:[%s1791_s1 + $0x30] sm:$0xff]  ;;  %v1095_v2 = vld [vmem:[%s1791_s1 + $0x28] sm:$0xff] }
   0x2   :  { %337 = vmatpush.bf16.msra.mxu0 %v1097_v0  ;;  %1098 = vmatpush.bf16.msra.mxu1 %v1097_v0  ;;  %v1094_v3 = vld [vmem:[%s1791_s1 + $0x20] sm:$0xff]  ;;  %v1093_v4 = vld [vmem:[%s1791_s1 + $0x18] sm:$0xff]  ;;  %v1092_v5 = vld [vmem:[%s1791_s1 + $0x10] sm:$0xff] }
   0x3   :  { %1099 = vmatpush.bf16.msra.mxu2 %v1097_v0  ;;  %1100 = vmatpush.bf16.msra.mxu3 %v1097_v0  ;;  %v1091_v6 = vld [vmem:[%s1791_s1 + $0x8] sm:$0xff]  ;;  %v1090_v7 = vld [vmem:[%s1791_s1] sm:$0xff]  ;;  %v1060_v16 = vld [vmem:[%s1793_s0 + $0x10] sm:$0xff] }
   0x4   :  { %v1058_v8 = vld [vmem:[%s1793_s0] sm:$0xff]  ;;  %v1059_v12 = vld [vmem:[%s1793_s0 + $0x8] sm:$0xff]  ;;  %v1068_v17 = vld [vmem:[%s1793_s0 + $0x50] sm:$0xff] }
   0x5   :  { %v1066_v9 = vld [vmem:[%s1793_s0 + $0x40] sm:$0xff]  ;;  %v1067_v13 = vld [vmem:[%s1793_s0 + $0x48] sm:$0xff]  ;;  %v1076_v18 = vld [vmem:[%s1793_s0 + $0x90] sm:$0xff] }
   0x6   :  { %338 = vmatpush.bf16.msra.mxu0 %v1096_v1  ;;  %1101 = vmatpush.bf16.msra.mxu1 %v1096_v1  ;;  %v1074_v10 = vld [vmem:[%s1793_s0 + $0x80] sm:$0xff]  ;;  %v1075_v14 = vld [vmem:[%s1793_s0 + $0x88] sm:$0xff]  ;;  %v1084_v19 = vld [vmem:[%s1793_s0 + $0xd0] sm:$0xff] }
   0x7   :  { %1102 = vmatpush.bf16.msra.mxu2 %v1096_v1  ;;  %1103 = vmatpush.bf16.msra.mxu3 %v1096_v1  ;;  %v1082_v11 = vld [vmem:[%s1793_s0 + $0xc0] sm:$0xff]  ;;  %v1083_v15 = vld [vmem:[%s1793_s0 + $0xc8] sm:$0xff]  ;;  %v1061_v20 = vld [vmem:[%s1793_s0 + $0x18] sm:$0xff] }
   0x8   :  { %v1069_v21 = vld [vmem:[%s1793_s0 + $0x58] sm:$0xff]  ;;  %v1062_v24 = vld [vmem:[%s1793_s0 + $0x20] sm:$0xff]  ;;  %v1063_v28 = vld [vmem:[%s1793_s0 + $0x28] sm:$0xff] }
   0x9   :  { %v1077_v22 = vld [vmem:[%s1793_s0 + $0x98] sm:$0xff]  ;;  %v1070_v25 = vld [vmem:[%s1793_s0 + $0x60] sm:$0xff]  ;;  %v1071_v29 = vld [vmem:[%s1793_s0 + $0x68] sm:$0xff] }
   0xa   :  { %339 = vmatpush.bf16.msra.mxu0 %v1095_v2  ;;  %1104 = vmatpush.bf16.msra.mxu1 %v1095_v2  ;;  %v1085_v23 = vld [vmem:[%s1793_s0 + $0xd8] sm:$0xff]  ;;  %v1078_v26 = vld [vmem:[%s1793_s0 + $0xa0] sm:$0xff]  ;;  %v1079_v30 = vld [vmem:[%s1793_s0 + $0xa8] sm:$0xff] }
   0xb   :  { %1105 = vmatpush.bf16.msra.mxu2 %v1095_v2  ;;  %1106 = vmatpush.bf16.msra.mxu3 %v1095_v2  ;;  %v1086_v27 = vld [vmem:[%s1793_s0 + $0xe0] sm:$0xff]  ;;  %v1087_v31 = vld [vmem:[%s1793_s0 + $0xe8] sm:$0xff]  ;;  %v1064_v32 = vld [vmem:[%s1793_s0 + $0x30] sm:$0xff] }
   0xc   :  { %v1072_v33 = vld [vmem:[%s1793_s0 + $0x70] sm:$0xff]  ;;  %v1065_v36 = vld [vmem:[%s1793_s0 + $0x38] sm:$0xff]  ;;  %v1272_v40 = vld [vmem:[%s1792_s2] ss:$0 sm:$0xff] }
   0xd   :  { %v1080_v34 = vld [vmem:[%s1793_s0 + $0xb0] sm:$0xff]  ;;  %v1073_v37 = vld [vmem:[%s1793_s0 + $0x78] sm:$0xff]  ;;  %v1277_v41 = vld [vmem:[%s1792_s2 + $0x1] ss:$0 sm:$0xff] }
   0xe   :  { %340 = vmatpush.bf16.msra.mxu0 %v1094_v3  ;;  %1107 = vmatpush.bf16.msra.mxu1 %v1094_v3  ;;  %v1088_v35 = vld [vmem:[%s1793_s0 + $0xf0] sm:$0xff]  ;;  %v1081_v38 = vld [vmem:[%s1793_s0 + $0xb8] sm:$0xff]  ;;  %v638_v46 = vld [vmem:[%s1794_s3] sm:$0xff] }
   0xf   :  { %1108 = vmatpush.bf16.msra.mxu2 %v1094_v3  ;;  %1109 = vmatpush.bf16.msra.mxu3 %v1094_v3  ;;  %v1089_v39 = vld [vmem:[%s1793_s0 + $0xf8] sm:$0xff]  ;;  %v654_v47 = vld [vmem:[%s1794_s3 + $0x80] sm:$0xff] }
  0x12   :  { %341 = vmatpush.bf16.msra.mxu0 %v1093_v4  ;;  %1110 = vmatpush.bf16.msra.mxu1 %v1093_v4 }
  0x13   :  { %1111 = vmatpush.bf16.msra.mxu2 %v1093_v4  ;;  %1112 = vmatpush.bf16.msra.mxu3 %v1093_v4 }
  0x16   :  { %342 = vmatpush.bf16.msra.mxu0 %v1092_v5  ;;  %1113 = vmatpush.bf16.msra.mxu1 %v1092_v5 }
  0x17   :  { %1114 = vmatpush.bf16.msra.mxu2 %v1092_v5  ;;  %1115 = vmatpush.bf16.msra.mxu3 %v1092_v5 }
  0x1a   :  { %343 = vmatpush.bf16.msra.mxu0 %v1091_v6  ;;  %1116 = vmatpush.bf16.msra.mxu1 %v1091_v6 }
  0x1b   :  { %1117 = vmatpush.bf16.msra.mxu2 %v1091_v6  ;;  %1118 = vmatpush.bf16.msra.mxu3 %v1091_v6 }
  0x1e   :  { %344 = vmatpush.bf16.msra.mxu0 %v1090_v7  ;;  %1119 = vmatpush.bf16.msra.mxu1 %v1090_v7 }
  0x1f   :  { %1120 = vmatpush.bf16.msra.mxu2 %v1090_v7  ;;  %1121 = vmatpush.bf16.msra.mxu3 %v1090_v7 }
  0x21   :  { %345 = vmatmul.bf16.vlgmr.msra.gmra.mxu0 %v1058_v8  ;;  %385 = vmatmul.bf16.vlgmr.msra.gmra.mxu1 %v1066_v9 }
  0x22   :  { %425 = vmatmul.bf16.vlgmr.msra.gmra.mxu2 %v1074_v10  ;;  %465 = vmatmul.bf16.vlgmr.msra.gmra.mxu3 %v1082_v11 }
  0x31   :  { %350 = vmatmul.bf16.gmra.mxu0 %v1059_v12  ;;  %390 = vmatmul.bf16.gmra.mxu1 %v1067_v13 }
  0x32   :  { %430 = vmatmul.bf16.gmra.mxu2 %v1075_v14  ;;  %470 = vmatmul.bf16.gmra.mxu3 %v1083_v15 }
  0x41   :  { %355 = vmatmul.bf16.gmra.mxu0 %v1060_v16  ;;  %395 = vmatmul.bf16.gmra.mxu1 %v1068_v17 }
  0x42   :  { %435 = vmatmul.bf16.gmra.mxu2 %v1076_v18  ;;  %475 = vmatmul.bf16.gmra.mxu3 %v1084_v19 }
  0x51   :  { %360 = vmatmul.bf16.gmra.mxu0 %v1061_v20  ;;  %400 = vmatmul.bf16.gmra.mxu1 %v1069_v21 }
  0x52   :  { %440 = vmatmul.bf16.gmra.mxu2 %v1077_v22  ;;  %480 = vmatmul.bf16.gmra.mxu3 %v1085_v23 }
  0x61   :  { %365 = vmatmul.bf16.gmra.mxu0 %v1062_v24  ;;  %405 = vmatmul.bf16.gmra.mxu1 %v1070_v25 }
  0x62   :  { %445 = vmatmul.bf16.gmra.mxu2 %v1078_v26  ;;  %485 = vmatmul.bf16.gmra.mxu3 %v1086_v27 }
  0x71   :  { %370 = vmatmul.bf16.gmra.mxu0 %v1063_v28  ;;  %410 = vmatmul.bf16.gmra.mxu1 %v1071_v29 }
  0x72   :  { %450 = vmatmul.bf16.gmra.mxu2 %v1079_v30  ;;  %490 = vmatmul.bf16.gmra.mxu3 %v1087_v31 }
  0x81   :  { %375 = vmatmul.bf16.gmra.mxu0 %v1064_v32  ;;  %415 = vmatmul.bf16.gmra.mxu1 %v1072_v33 }
  0x82   :  { %455 = vmatmul.bf16.gmra.mxu2 %v1080_v34  ;;  %495 = vmatmul.bf16.gmra.mxu3 %v1088_v35 }
  0x91   :  { %380 = vmatmul.bf16.gmra.mxu0 %v1065_v36  ;;  %420 = vmatmul.bf16.gmra.mxu1 %v1073_v37 }
  0x92   :  { %460 = vmatmul.bf16.gmra.mxu2 %v1081_v38  ;;  %500 = vmatmul.bf16.gmra.mxu3 %v1089_v39 }
  0x9e   :  { %v346_v42 = vpop.f32.mrf.mxu0  ;;  %v386_v43 = vpop.f32.mrf.mxu1 }
  0x9f   :  { %v509_v44 = vmul.f32 %v1272_v40, %v346_v42  ;;  %v525_v45 = vmul.f32 %v1272_v40, %v386_v43 }
  0xa1   :  { %v574_v48 = vadd.f32 %v1277_v41, %v509_v44  ;;  %v590_v49 = vadd.f32 %v1277_v41, %v525_v45 }
  0xa3   :  { %v702_v50 = vadd.f32 %v638_v46, %v574_v48  ;;  %v718_v51 = vadd.f32 %v654_v47, %v590_v49 }
  0xa5   :  { %v766_v52 = vmax.f32 %v702_v50, 0.0  ;;  %v782_v53 = vmax.f32 %v718_v51, 0.0  ;;  %v426_v54 = vpop.f32.mrf.mxu2  ;;  %v466_v55 = vpop.f32.mrf.mxu3 }
  0xa6   :  { %v541_v56 = vmul.f32 %v1272_v40, %v426_v54  ;;  %v557_v57 = vmul.f32 %v1272_v40, %v466_v55  ;;  %v348_v58 = vpop.f32.mrf.mxu0  ;;  %v388_v59 = vpop.f32.mrf.mxu1 }
  0xa7   :  { %830 = vst [vmem:[%s1795_s4] sm:$0xff] %v766_v52  ;;  %v510_v62 = vmul.f32 %v1272_v40, %v348_v58  ;;  %v526_v63 = vmul.f32 %v1272_v40, %v388_v59 }
  0xa8   :  { %v606_v0 = vadd.f32 %v1277_v41, %v541_v56  ;;  %v622_v1 = vadd.f32 %v1277_v41, %v557_v57 }
  0xa9   :  { %v575_v4 = vadd.f32 %v1277_v41, %v510_v62  ;;  %v591_v5 = vadd.f32 %v1277_v41, %v526_v63 }
  0xad   :  { %v428_v14 = vpop.f32.mrf.mxu2  ;;  %v468_v15 = vpop.f32.mrf.mxu3 }
  0xae   :  { %v670_v60 = vld [vmem:[%s1794_s3 + $0x100] sm:$0xff]  ;;  %v542_v16 = vmul.f32 %v1272_v40, %v428_v14  ;;  %v558_v17 = vmul.f32 %v1272_v40, %v468_v15  ;;  %v351_v18 = vpop.f32.mrf.mxu0  ;;  %v391_v19 = vpop.f32.mrf.mxu1 }
  0xaf   :  { %v686_v61 = vld [vmem:[%s1794_s3 + $0x180] sm:$0xff]  ;;  %v734_v6 = vadd.f32 %v670_v60, %v606_v0  ;;  %v511_v22 = vmul.f32 %v1272_v40, %v351_v18  ;;  %v527_v23 = vmul.f32 %v1272_v40, %v391_v19 }
  0xb0   :  { %846 = vst [vmem:[%s1795_s4 + $0x80] sm:$0xff] %v782_v53  ;;  %v750_v7 = vadd.f32 %v686_v61, %v622_v1  ;;  %v607_v24 = vadd.f32 %v1277_v41, %v542_v16  ;;  %v623_v25 = vadd.f32 %v1277_v41, %v558_v17 }
  0xb1   :  { %v798_v10 = vmax.f32 %v734_v6, 0.0  ;;  %v576_v28 = vadd.f32 %v1277_v41, %v511_v22  ;;  %v592_v29 = vadd.f32 %v1277_v41, %v527_v23 }
  0xb2   :  { %v814_v11 = vmax.f32 %v750_v7, 0.0 }
  0xb5   :  { %v431_v38 = vpop.f32.mrf.mxu2  ;;  %v471_v39 = vpop.f32.mrf.mxu3 }
  0xb6   :  { %v543_v42 = vmul.f32 %v1272_v40, %v431_v38  ;;  %v559_v43 = vmul.f32 %v1272_v40, %v471_v39  ;;  %v353_v44 = vpop.f32.mrf.mxu0  ;;  %v393_v45 = vpop.f32.mrf.mxu1 }
  0xb7   :  { %v639_v2 = vld [vmem:[%s1794_s3 + $0x8] sm:$0xff]  ;;  %v512_v48 = vmul.f32 %v1272_v40, %v353_v44  ;;  %v528_v49 = vmul.f32 %v1272_v40, %v393_v45 }
  0xb8   :  { %v655_v3 = vld [vmem:[%s1794_s3 + $0x88] sm:$0xff]  ;;  %v703_v8 = vadd.f32 %v639_v2, %v575_v4  ;;  %v608_v50 = vadd.f32 %v1277_v41, %v543_v42  ;;  %v624_v51 = vadd.f32 %v1277_v41, %v559_v43 }
  0xb9   :  { %v719_v9 = vadd.f32 %v655_v3, %v591_v5  ;;  %862 = vst [vmem:[%s1795_s4 + $0x100] sm:$0xff] %v798_v10  ;;  %v577_v54 = vadd.f32 %v1277_v41, %v512_v48  ;;  %v593_v55 = vadd.f32 %v1277_v41, %v528_v49 }
  0xba   :  { %v767_v12 = vmax.f32 %v703_v8, 0.0  ;;  %878 = vst [vmem:[%s1795_s4 + $0x180] sm:$0xff] %v814_v11 }
  0xbb   :  { %v783_v13 = vmax.f32 %v719_v9, 0.0 }
  0xbd   :  { %v433_v0 = vpop.f32.mrf.mxu2  ;;  %v473_v1 = vpop.f32.mrf.mxu3 }
  0xbe   :  { %v544_v2 = vmul.f32 %v1272_v40, %v433_v0  ;;  %v560_v3 = vmul.f32 %v1272_v40, %v473_v1  ;;  %v356_v4 = vpop.f32.mrf.mxu0  ;;  %v396_v5 = vpop.f32.mrf.mxu1 }
  0xbf   :  { %v513_v8 = vmul.f32 %v1272_v40, %v356_v4  ;;  %v529_v9 = vmul.f32 %v1272_v40, %v396_v5 }
  0xc0   :  { %v609_v10 = vadd.f32 %v1277_v41, %v544_v2  ;;  %v625_v11 = vadd.f32 %v1277_v41, %v560_v3 }
  0xc1   :  { %v671_v20 = vld [vmem:[%s1794_s3 + $0x108] sm:$0xff]  ;;  %v578_v14 = vadd.f32 %v1277_v41, %v513_v8  ;;  %v594_v15 = vadd.f32 %v1277_v41, %v529_v9 }
  0xc2   :  { %v687_v21 = vld [vmem:[%s1794_s3 + $0x188] sm:$0xff]  ;;  %v735_v30 = vadd.f32 %v671_v20, %v607_v24 }
  0xc3   :  { %831 = vst [vmem:[%s1795_s4 + $0x8] sm:$0xff] %v767_v12  ;;  %v751_v31 = vadd.f32 %v687_v21, %v623_v25 }
  0xc4   :  { %v799_v34 = vmax.f32 %v735_v30, 0.0 }
  0xc5   :  { %v815_v35 = vmax.f32 %v751_v31, 0.0  ;;  %v436_v24 = vpop.f32.mrf.mxu2  ;;  %v476_v25 = vpop.f32.mrf.mxu3 }
  0xca   :  { %v640_v26 = vld [vmem:[%s1794_s3 + $0x10] sm:$0xff] }
  0xcb   :  { %v656_v27 = vld [vmem:[%s1794_s3 + $0x90] sm:$0xff]  ;;  %v704_v32 = vadd.f32 %v640_v26, %v576_v28  ;;  %v545_v26 = vmul.f32 %v1272_v40, %v436_v24  ;;  %v358_v28 = vpop.f32.mrf.mxu0 }
  0xcc   :  { %847 = vst [vmem:[%s1795_s4 + $0x88] sm:$0xff] %v783_v13  ;;  %v720_v33 = vadd.f32 %v656_v27, %v592_v29  ;;  %v561_v27 = vmul.f32 %v1272_v40, %v476_v25  ;;  %v398_v29 = vpop.f32.mrf.mxu1 }
  0xcd   :  { %v768_v36 = vmax.f32 %v704_v32, 0.0  ;;  %863 = vst [vmem:[%s1795_s4 + $0x108] sm:$0xff] %v799_v34  ;;  %v514_v32 = vmul.f32 %v1272_v40, %v358_v28  ;;  %v610_v34 = vadd.f32 %v1277_v41, %v545_v26 }
  0xce   :  { %v784_v37 = vmax.f32 %v720_v33, 0.0  ;;  %879 = vst [vmem:[%s1795_s4 + $0x188] sm:$0xff] %v815_v35  ;;  %v530_v33 = vmul.f32 %v1272_v40, %v398_v29  ;;  %v626_v35 = vadd.f32 %v1277_v41, %v561_v27 }
  0xcf   :  { %v579_v38 = vadd.f32 %v1277_v41, %v514_v32 }
  0xd0   :  { %v595_v39 = vadd.f32 %v1277_v41, %v530_v33 }
  0xd5   :  { %v672_v46 = vld [vmem:[%s1794_s3 + $0x110] sm:$0xff] }
  0xd6   :  { %v688_v47 = vld [vmem:[%s1794_s3 + $0x190] sm:$0xff]  ;;  %v736_v56 = vadd.f32 %v672_v46, %v608_v50  ;;  %v438_v50 = vpop.f32.mrf.mxu2 }
  0xd7   :  { %832 = vst [vmem:[%s1795_s4 + $0x10] sm:$0xff] %v768_v36  ;;  %v752_v57 = vadd.f32 %v688_v47, %v624_v51  ;;  %v478_v51 = vpop.f32.mrf.mxu3 }
  0xd8   :  { %v800_v60 = vmax.f32 %v736_v56, 0.0 }
  0xd9   :  { %v816_v61 = vmax.f32 %v752_v57, 0.0 }
  0xde   :  { %v641_v52 = vld [vmem:[%s1794_s3 + $0x18] sm:$0xff] }
  0xdf   :  { %v657_v53 = vld [vmem:[%s1794_s3 + $0x98] sm:$0xff]  ;;  %v705_v58 = vadd.f32 %v641_v52, %v577_v54  ;;  %v546_v52 = vmul.f32 %v1272_v40, %v438_v50  ;;  %v361_v54 = vpop.f32.mrf.mxu0 }
  0xe0   :  { %848 = vst [vmem:[%s1795_s4 + $0x90] sm:$0xff] %v784_v37  ;;  %v721_v59 = vadd.f32 %v657_v53, %v593_v55  ;;  %v562_v53 = vmul.f32 %v1272_v40, %v478_v51  ;;  %v401_v55 = vpop.f32.mrf.mxu1 }
  0xe1   :  { %v769_v62 = vmax.f32 %v705_v58, 0.0  ;;  %864 = vst [vmem:[%s1795_s4 + $0x110] sm:$0xff] %v800_v60  ;;  %v515_v58 = vmul.f32 %v1272_v40, %v361_v54  ;;  %v611_v60 = vadd.f32 %v1277_v41, %v546_v52 }
  0xe2   :  { %v785_v63 = vmax.f32 %v721_v59, 0.0  ;;  %880 = vst [vmem:[%s1795_s4 + $0x190] sm:$0xff] %v816_v61  ;;  %v531_v59 = vmul.f32 %v1272_v40, %v401_v55  ;;  %v627_v61 = vadd.f32 %v1277_v41, %v562_v53 }
  0xe3   :  { %v580_v0 = vadd.f32 %v1277_v41, %v515_v58 }
  0xe4   :  { %v596_v1 = vadd.f32 %v1277_v41, %v531_v59 }
  0xe9   :  { %v673_v6 = vld [vmem:[%s1794_s3 + $0x118] sm:$0xff] }
  0xea   :  { %v689_v7 = vld [vmem:[%s1794_s3 + $0x198] sm:$0xff]  ;;  %v737_v16 = vadd.f32 %v673_v6, %v609_v10  ;;  %v441_v10 = vpop.f32.mrf.mxu2 }
  0xeb   :  { %833 = vst [vmem:[%s1795_s4 + $0x18] sm:$0xff] %v769_v62  ;;  %v753_v17 = vadd.f32 %v689_v7, %v625_v11  ;;  %v481_v11 = vpop.f32.mrf.mxu3 }
  0xec   :  { %v801_v20 = vmax.f32 %v737_v16, 0.0 }
  0xed   :  { %v817_v21 = vmax.f32 %v753_v17, 0.0 }
  0xf2   :  { %v642_v12 = vld [vmem:[%s1794_s3 + $0x20] sm:$0xff] }
  0xf3   :  { %v658_v13 = vld [vmem:[%s1794_s3 + $0xa0] sm:$0xff]  ;;  %v706_v18 = vadd.f32 %v642_v12, %v578_v14  ;;  %v547_v12 = vmul.f32 %v1272_v40, %v441_v10  ;;  %v363_v14 = vpop.f32.mrf.mxu0 }
  0xf4   :  { %849 = vst [vmem:[%s1795_s4 + $0x98] sm:$0xff] %v785_v63  ;;  %v722_v19 = vadd.f32 %v658_v13, %v594_v15  ;;  %v563_v13 = vmul.f32 %v1272_v40, %v481_v11  ;;  %v403_v15 = vpop.f32.mrf.mxu1 }
  0xf5   :  { %v770_v22 = vmax.f32 %v706_v18, 0.0  ;;  %865 = vst [vmem:[%s1795_s4 + $0x118] sm:$0xff] %v801_v20  ;;  %v516_v18 = vmul.f32 %v1272_v40, %v363_v14  ;;  %v612_v20 = vadd.f32 %v1277_v41, %v547_v12 }
  0xf6   :  { %v786_v23 = vmax.f32 %v722_v19, 0.0  ;;  %881 = vst [vmem:[%s1795_s4 + $0x198] sm:$0xff] %v817_v21  ;;  %v532_v19 = vmul.f32 %v1272_v40, %v403_v15  ;;  %v628_v21 = vadd.f32 %v1277_v41, %v563_v13 }
  0xf7   :  { %v581_v24 = vadd.f32 %v1277_v41, %v516_v18 }
  0xf8   :  { %v597_v25 = vadd.f32 %v1277_v41, %v532_v19 }
  0xfd   :  { %v674_v30 = vld [vmem:[%s1794_s3 + $0x120] sm:$0xff] }
  0xfe   :  { %v690_v31 = vld [vmem:[%s1794_s3 + $0x1a0] sm:$0xff]  ;;  %v738_v42 = vadd.f32 %v674_v30, %v610_v34  ;;  %v443_v34 = vpop.f32.mrf.mxu2 }
  0xff   :  { %834 = vst [vmem:[%s1795_s4 + $0x20] sm:$0xff] %v770_v22  ;;  %v754_v43 = vadd.f32 %v690_v31, %v626_v35  ;;  %v483_v35 = vpop.f32.mrf.mxu3 }
 0x100   :  { %v802_v46 = vmax.f32 %v738_v42, 0.0 }
 0x101   :  { %v818_v47 = vmax.f32 %v754_v43, 0.0 }
 0x106   :  { %v643_v36 = vld [vmem:[%s1794_s3 + $0x28] sm:$0xff] }
 0x107   :  { %v659_v37 = vld [vmem:[%s1794_s3 + $0xa8] sm:$0xff]  ;;  %v707_v44 = vadd.f32 %v643_v36, %v579_v38  ;;  %v548_v36 = vmul.f32 %v1272_v40, %v443_v34  ;;  %v366_v38 = vpop.f32.mrf.mxu0 }
 0x108   :  { %850 = vst [vmem:[%s1795_s4 + $0xa0] sm:$0xff] %v786_v23  ;;  %v723_v45 = vadd.f32 %v659_v37, %v595_v39  ;;  %v564_v37 = vmul.f32 %v1272_v40, %v483_v35  ;;  %v406_v39 = vpop.f32.mrf.mxu1 }
 0x109   :  { %v771_v48 = vmax.f32 %v707_v44, 0.0  ;;  %866 = vst [vmem:[%s1795_s4 + $0x120] sm:$0xff] %v802_v46  ;;  %v517_v44 = vmul.f32 %v1272_v40, %v366_v38  ;;  %v613_v46 = vadd.f32 %v1277_v41, %v548_v36 }
 0x10a   :  { %v787_v49 = vmax.f32 %v723_v45, 0.0  ;;  %882 = vst [vmem:[%s1795_s4 + $0x1a0] sm:$0xff] %v818_v47  ;;  %v533_v45 = vmul.f32 %v1272_v40, %v406_v39  ;;  %v629_v47 = vadd.f32 %v1277_v41, %v564_v37 }
 0x10b   :  { %v582_v50 = vadd.f32 %v1277_v41, %v517_v44 }
 0x10c   :  { %v598_v51 = vadd.f32 %v1277_v41, %v533_v45 }
 0x111   :  { %v675_v56 = vld [vmem:[%s1794_s3 + $0x128] sm:$0xff] }
 0x112   :  { %v691_v57 = vld [vmem:[%s1794_s3 + $0x1a8] sm:$0xff]  ;;  %v739_v2 = vadd.f32 %v675_v56, %v611_v60  ;;  %v446_v60 = vpop.f32.mrf.mxu2 }
 0x113   :  { %835 = vst [vmem:[%s1795_s4 + $0x28] sm:$0xff] %v771_v48  ;;  %v755_v3 = vadd.f32 %v691_v57, %v627_v61  ;;  %v486_v61 = vpop.f32.mrf.mxu3 }
 0x114   :  { %v803_v6 = vmax.f32 %v739_v2, 0.0 }
 0x115   :  { %v819_v7 = vmax.f32 %v755_v3, 0.0 }
 0x11a   :  { %v644_v62 = vld [vmem:[%s1794_s3 + $0x30] sm:$0xff] }
 0x11b   :  { %v660_v63 = vld [vmem:[%s1794_s3 + $0xb0] sm:$0xff]  ;;  %v708_v4 = vadd.f32 %v644_v62, %v580_v0  ;;  %v549_v62 = vmul.f32 %v1272_v40, %v446_v60  ;;  %v368_v0 = vpop.f32.mrf.mxu0 }
 0x11c   :  { %851 = vst [vmem:[%s1795_s4 + $0xa8] sm:$0xff] %v787_v49  ;;  %v724_v5 = vadd.f32 %v660_v63, %v596_v1  ;;  %v565_v63 = vmul.f32 %v1272_v40, %v486_v61  ;;  %v408_v1 = vpop.f32.mrf.mxu1 }
 0x11d   :  { %v772_v8 = vmax.f32 %v708_v4, 0.0  ;;  %867 = vst [vmem:[%s1795_s4 + $0x128] sm:$0xff] %v803_v6  ;;  %v518_v4 = vmul.f32 %v1272_v40, %v368_v0  ;;  %v614_v6 = vadd.f32 %v1277_v41, %v549_v62 }
 0x11e   :  { %v788_v9 = vmax.f32 %v724_v5, 0.0  ;;  %883 = vst [vmem:[%s1795_s4 + $0x1a8] sm:$0xff] %v819_v7  ;;  %v534_v5 = vmul.f32 %v1272_v40, %v408_v1  ;;  %v630_v7 = vadd.f32 %v1277_v41, %v565_v63 }
 0x11f   :  { %v583_v10 = vadd.f32 %v1277_v41, %v518_v4 }
 0x120   :  { %v599_v11 = vadd.f32 %v1277_v41, %v534_v5 }
 0x125   :  { %v676_v16 = vld [vmem:[%s1794_s3 + $0x130] sm:$0xff] }
 0x126   :  { %v692_v17 = vld [vmem:[%s1794_s3 + $0x1b0] sm:$0xff]  ;;  %v740_v26 = vadd.f32 %v676_v16, %v612_v20  ;;  %v448_v20 = vpop.f32.mrf.mxu2 }
 0x127   :  { %836 = vst [vmem:[%s1795_s4 + $0x30] sm:$0xff] %v772_v8  ;;  %v756_v27 = vadd.f32 %v692_v17, %v628_v21  ;;  %v488_v21 = vpop.f32.mrf.mxu3 }
 0x128   :  { %v804_v30 = vmax.f32 %v740_v26, 0.0 }
 0x129   :  { %v820_v31 = vmax.f32 %v756_v27, 0.0 }
 0x12e   :  { %v645_v22 = vld [vmem:[%s1794_s3 + $0x38] sm:$0xff] }
 0x12f   :  { %v661_v23 = vld [vmem:[%s1794_s3 + $0xb8] sm:$0xff]  ;;  %v709_v28 = vadd.f32 %v645_v22, %v581_v24  ;;  %v550_v22 = vmul.f32 %v1272_v40, %v448_v20  ;;  %v371_v24 = vpop.f32.mrf.mxu0 }
 0x130   :  { %852 = vst [vmem:[%s1795_s4 + $0xb0] sm:$0xff] %v788_v9  ;;  %v725_v29 = vadd.f32 %v661_v23, %v597_v25  ;;  %v566_v23 = vmul.f32 %v1272_v40, %v488_v21  ;;  %v411_v25 = vpop.f32.mrf.mxu1 }
 0x131   :  { %v773_v32 = vmax.f32 %v709_v28, 0.0  ;;  %868 = vst [vmem:[%s1795_s4 + $0x130] sm:$0xff] %v804_v30  ;;  %v519_v28 = vmul.f32 %v1272_v40, %v371_v24  ;;  %v615_v30 = vadd.f32 %v1277_v41, %v550_v22 }
 0x132   :  { %v789_v33 = vmax.f32 %v725_v29, 0.0  ;;  %884 = vst [vmem:[%s1795_s4 + $0x1b0] sm:$0xff] %v820_v31  ;;  %v535_v29 = vmul.f32 %v1272_v40, %v411_v25  ;;  %v631_v31 = vadd.f32 %v1277_v41, %v566_v23 }
 0x133   :  { %v584_v34 = vadd.f32 %v1277_v41, %v519_v28 }
 0x134   :  { %v600_v35 = vadd.f32 %v1277_v41, %v535_v29 }
 0x139   :  { %v677_v42 = vld [vmem:[%s1794_s3 + $0x138] sm:$0xff] }
 0x13a   :  { %v693_v43 = vld [vmem:[%s1794_s3 + $0x1b8] sm:$0xff]  ;;  %v741_v52 = vadd.f32 %v677_v42, %v613_v46  ;;  %v451_v46 = vpop.f32.mrf.mxu2 }
 0x13b   :  { %837 = vst [vmem:[%s1795_s4 + $0x38] sm:$0xff] %v773_v32  ;;  %v757_v53 = vadd.f32 %v693_v43, %v629_v47  ;;  %v491_v47 = vpop.f32.mrf.mxu3 }
 0x13c   :  { %v805_v56 = vmax.f32 %v741_v52, 0.0 }
 0x13d   :  { %v821_v57 = vmax.f32 %v757_v53, 0.0 }
 0x142   :  { %v646_v48 = vld [vmem:[%s1794_s3 + $0x40] sm:$0xff] }
 0x143   :  { %v662_v49 = vld [vmem:[%s1794_s3 + $0xc0] sm:$0xff]  ;;  %v710_v54 = vadd.f32 %v646_v48, %v582_v50  ;;  %v551_v48 = vmul.f32 %v1272_v40, %v451_v46  ;;  %v373_v50 = vpop.f32.mrf.mxu0 }
 0x144   :  { %853 = vst [vmem:[%s1795_s4 + $0xb8] sm:$0xff] %v789_v33  ;;  %v726_v55 = vadd.f32 %v662_v49, %v598_v51  ;;  %v567_v49 = vmul.f32 %v1272_v40, %v491_v47  ;;  %v413_v51 = vpop.f32.mrf.mxu1 }
 0x145   :  { %v774_v58 = vmax.f32 %v710_v54, 0.0  ;;  %869 = vst [vmem:[%s1795_s4 + $0x138] sm:$0xff] %v805_v56  ;;  %v520_v54 = vmul.f32 %v1272_v40, %v373_v50  ;;  %v616_v56 = vadd.f32 %v1277_v41, %v551_v48 }
 0x146   :  { %v790_v59 = vmax.f32 %v726_v55, 0.0  ;;  %885 = vst [vmem:[%s1795_s4 + $0x1b8] sm:$0xff] %v821_v57  ;;  %v536_v55 = vmul.f32 %v1272_v40, %v413_v51  ;;  %v632_v57 = vadd.f32 %v1277_v41, %v567_v49 }
 0x147   :  { %v585_v60 = vadd.f32 %v1277_v41, %v520_v54 }
 0x148   :  { %v601_v61 = vadd.f32 %v1277_v41, %v536_v55 }
 0x14d   :  { %v678_v2 = vld [vmem:[%s1794_s3 + $0x140] sm:$0xff] }
 0x14e   :  { %v694_v3 = vld [vmem:[%s1794_s3 + $0x1c0] sm:$0xff]  ;;  %v742_v12 = vadd.f32 %v678_v2, %v614_v6  ;;  %v453_v6 = vpop.f32.mrf.mxu2 }
 0x14f   :  { %838 = vst [vmem:[%s1795_s4 + $0x40] sm:$0xff] %v774_v58  ;;  %v758_v13 = vadd.f32 %v694_v3, %v630_v7  ;;  %v493_v7 = vpop.f32.mrf.mxu3 }
 0x150   :  { %v806_v16 = vmax.f32 %v742_v12, 0.0 }
 0x151   :  { %v822_v17 = vmax.f32 %v758_v13, 0.0 }
 0x156   :  { %v647_v8 = vld [vmem:[%s1794_s3 + $0x48] sm:$0xff] }
 0x157   :  { %v663_v9 = vld [vmem:[%s1794_s3 + $0xc8] sm:$0xff]  ;;  %v711_v14 = vadd.f32 %v647_v8, %v583_v10  ;;  %v552_v8 = vmul.f32 %v1272_v40, %v453_v6  ;;  %v376_v10 = vpop.f32.mrf.mxu0 }
 0x158   :  { %854 = vst [vmem:[%s1795_s4 + $0xc0] sm:$0xff] %v790_v59  ;;  %v727_v15 = vadd.f32 %v663_v9, %v599_v11  ;;  %v568_v9 = vmul.f32 %v1272_v40, %v493_v7  ;;  %v416_v11 = vpop.f32.mrf.mxu1 }
 0x159   :  { %v775_v18 = vmax.f32 %v711_v14, 0.0  ;;  %870 = vst [vmem:[%s1795_s4 + $0x140] sm:$0xff] %v806_v16  ;;  %v521_v14 = vmul.f32 %v1272_v40, %v376_v10  ;;  %v617_v16 = vadd.f32 %v1277_v41, %v552_v8 }
 0x15a   :  { %v791_v19 = vmax.f32 %v727_v15, 0.0  ;;  %886 = vst [vmem:[%s1795_s4 + $0x1c0] sm:$0xff] %v822_v17  ;;  %v537_v15 = vmul.f32 %v1272_v40, %v416_v11  ;;  %v633_v17 = vadd.f32 %v1277_v41, %v568_v9 }
 0x15b   :  { %v586_v20 = vadd.f32 %v1277_v41, %v521_v14 }
 0x15c   :  { %v602_v21 = vadd.f32 %v1277_v41, %v537_v15 }
 0x161   :  { %v679_v26 = vld [vmem:[%s1794_s3 + $0x148] sm:$0xff] }
 0x162   :  { %v695_v27 = vld [vmem:[%s1794_s3 + $0x1c8] sm:$0xff]  ;;  %v743_v36 = vadd.f32 %v679_v26, %v615_v30  ;;  %v456_v30 = vpop.f32.mrf.mxu2 }
 0x163   :  { %839 = vst [vmem:[%s1795_s4 + $0x48] sm:$0xff] %v775_v18  ;;  %v759_v37 = vadd.f32 %v695_v27, %v631_v31  ;;  %v496_v31 = vpop.f32.mrf.mxu3 }
 0x164   :  { %v807_v42 = vmax.f32 %v743_v36, 0.0 }
 0x165   :  { %v823_v43 = vmax.f32 %v759_v37, 0.0 }
 0x16a   :  { %v648_v32 = vld [vmem:[%s1794_s3 + $0x50] sm:$0xff] }
 0x16b   :  { %v664_v33 = vld [vmem:[%s1794_s3 + $0xd0] sm:$0xff]  ;;  %v712_v38 = vadd.f32 %v648_v32, %v584_v34  ;;  %v553_v32 = vmul.f32 %v1272_v40, %v456_v30  ;;  %v378_v34 = vpop.f32.mrf.mxu0 }
 0x16c   :  { %855 = vst [vmem:[%s1795_s4 + $0xc8] sm:$0xff] %v791_v19  ;;  %v728_v39 = vadd.f32 %v664_v33, %v600_v35  ;;  %v569_v33 = vmul.f32 %v1272_v40, %v496_v31  ;;  %v418_v35 = vpop.f32.mrf.mxu1 }
 0x16d   :  { %v776_v44 = vmax.f32 %v712_v38, 0.0  ;;  %871 = vst [vmem:[%s1795_s4 + $0x148] sm:$0xff] %v807_v42  ;;  %v522_v38 = vmul.f32 %v1272_v40, %v378_v34  ;;  %v618_v42 = vadd.f32 %v1277_v41, %v553_v32 }
 0x16e   :  { %v792_v45 = vmax.f32 %v728_v39, 0.0  ;;  %887 = vst [vmem:[%s1795_s4 + $0x1c8] sm:$0xff] %v823_v43  ;;  %v538_v39 = vmul.f32 %v1272_v40, %v418_v35  ;;  %v634_v43 = vadd.f32 %v1277_v41, %v569_v33 }
 0x16f   :  { %v587_v46 = vadd.f32 %v1277_v41, %v522_v38 }
 0x170   :  { %v603_v47 = vadd.f32 %v1277_v41, %v538_v39 }
 0x175   :  { %v680_v52 = vld [vmem:[%s1794_s3 + $0x150] sm:$0xff] }
 0x176   :  { %v696_v53 = vld [vmem:[%s1794_s3 + $0x1d0] sm:$0xff]  ;;  %v744_v62 = vadd.f32 %v680_v52, %v616_v56  ;;  %v458_v56 = vpop.f32.mrf.mxu2 }
 0x177   :  { %840 = vst [vmem:[%s1795_s4 + $0x50] sm:$0xff] %v776_v44  ;;  %v760_v63 = vadd.f32 %v696_v53, %v632_v57  ;;  %v498_v57 = vpop.f32.mrf.mxu3 }
 0x178   :  { %v808_v2 = vmax.f32 %v744_v62, 0.0 }
 0x179   :  { %v824_v3 = vmax.f32 %v760_v63, 0.0 }
 0x17e   :  { %v649_v58 = vld [vmem:[%s1794_s3 + $0x58] sm:$0xff] }
 0x17f   :  { %v665_v59 = vld [vmem:[%s1794_s3 + $0xd8] sm:$0xff]  ;;  %v713_v0 = vadd.f32 %v649_v58, %v585_v60  ;;  %v554_v58 = vmul.f32 %v1272_v40, %v458_v56  ;;  %v381_v60 = vpop.f32.mrf.mxu0 }
 0x180   :  { %856 = vst [vmem:[%s1795_s4 + $0xd0] sm:$0xff] %v792_v45  ;;  %v729_v1 = vadd.f32 %v665_v59, %v601_v61  ;;  %v570_v59 = vmul.f32 %v1272_v40, %v498_v57  ;;  %v421_v61 = vpop.f32.mrf.mxu1 }
 0x181   :  { %v777_v4 = vmax.f32 %v713_v0, 0.0  ;;  %872 = vst [vmem:[%s1795_s4 + $0x150] sm:$0xff] %v808_v2  ;;  %v523_v0 = vmul.f32 %v1272_v40, %v381_v60  ;;  %v619_v2 = vadd.f32 %v1277_v41, %v554_v58 }
 0x182   :  { %v793_v5 = vmax.f32 %v729_v1, 0.0  ;;  %888 = vst [vmem:[%s1795_s4 + $0x1d0] sm:$0xff] %v824_v3  ;;  %v539_v1 = vmul.f32 %v1272_v40, %v421_v61  ;;  %v635_v3 = vadd.f32 %v1277_v41, %v570_v59 }
 0x183   :  { %v588_v6 = vadd.f32 %v1277_v41, %v523_v0 }
 0x184   :  { %v604_v7 = vadd.f32 %v1277_v41, %v539_v1 }
 0x189   :  { %v681_v12 = vld [vmem:[%s1794_s3 + $0x158] sm:$0xff] }
 0x18a   :  { %v697_v13 = vld [vmem:[%s1794_s3 + $0x1d8] sm:$0xff]  ;;  %v745_v22 = vadd.f32 %v681_v12, %v617_v16  ;;  %v461_v16 = vpop.f32.mrf.mxu2 }
 0x18b   :  { %841 = vst [vmem:[%s1795_s4 + $0x58] sm:$0xff] %v777_v4  ;;  %v761_v23 = vadd.f32 %v697_v13, %v633_v17  ;;  %v501_v17 = vpop.f32.mrf.mxu3 }
 0x18c   :  { %v809_v26 = vmax.f32 %v745_v22, 0.0 }
 0x18d   :  { %v825_v27 = vmax.f32 %v761_v23, 0.0 }
 0x192   :  { %v650_v18 = vld [vmem:[%s1794_s3 + $0x60] sm:$0xff] }
 0x193   :  { %v666_v19 = vld [vmem:[%s1794_s3 + $0xe0] sm:$0xff]  ;;  %v714_v24 = vadd.f32 %v650_v18, %v586_v20  ;;  %v555_v18 = vmul.f32 %v1272_v40, %v461_v16  ;;  %v383_v20 = vpop.f32.mrf.mxu0 }
 0x194   :  { %857 = vst [vmem:[%s1795_s4 + $0xd8] sm:$0xff] %v793_v5  ;;  %v730_v25 = vadd.f32 %v666_v19, %v602_v21  ;;  %v571_v19 = vmul.f32 %v1272_v40, %v501_v17  ;;  %v423_v21 = vpop.f32.mrf.mxu1 }
 0x195   :  { %v778_v28 = vmax.f32 %v714_v24, 0.0  ;;  %873 = vst [vmem:[%s1795_s4 + $0x158] sm:$0xff] %v809_v26  ;;  %v524_v24 = vmul.f32 %v1272_v40, %v383_v20  ;;  %v620_v26 = vadd.f32 %v1277_v41, %v555_v18 }
 0x196   :  { %v794_v29 = vmax.f32 %v730_v25, 0.0  ;;  %889 = vst [vmem:[%s1795_s4 + $0x1d8] sm:$0xff] %v825_v27  ;;  %v540_v25 = vmul.f32 %v1272_v40, %v423_v21  ;;  %v636_v27 = vadd.f32 %v1277_v41, %v571_v19 }
 0x197   :  { %v589_v30 = vadd.f32 %v1277_v41, %v524_v24 }
 0x198   :  { %v605_v31 = vadd.f32 %v1277_v41, %v540_v25 }
 0x19d   :  { %v682_v36 = vld [vmem:[%s1794_s3 + $0x160] sm:$0xff] }
 0x19e   :  { %v698_v37 = vld [vmem:[%s1794_s3 + $0x1e0] sm:$0xff]  ;;  %v746_v48 = vadd.f32 %v682_v36, %v618_v42  ;;  %v463_v42 = vpop.f32.mrf.mxu2 }
 0x19f   :  { %842 = vst [vmem:[%s1795_s4 + $0x60] sm:$0xff] %v778_v28  ;;  %v762_v49 = vadd.f32 %v698_v37, %v634_v43  ;;  %v503_v43 = vpop.f32.mrf.mxu3 }
 0x1a0   :  { %v810_v52 = vmax.f32 %v746_v48, 0.0 }
 0x1a1   :  { %v826_v53 = vmax.f32 %v762_v49, 0.0 }
 0x1a6   :  { %v651_v44 = vld [vmem:[%s1794_s3 + $0x68] sm:$0xff] }
 0x1a7   :  { %v667_v45 = vld [vmem:[%s1794_s3 + $0xe8] sm:$0xff]  ;;  %v715_v50 = vadd.f32 %v651_v44, %v587_v46  ;;  %v556_v44 = vmul.f32 %v1272_v40, %v463_v42 }
 0x1a8   :  { %858 = vst [vmem:[%s1795_s4 + $0xe0] sm:$0xff] %v794_v29  ;;  %v731_v51 = vadd.f32 %v667_v45, %v603_v47  ;;  %v572_v45 = vmul.f32 %v1272_v40, %v503_v43 }
 0x1a9   :  { %v779_v54 = vmax.f32 %v715_v50, 0.0  ;;  %874 = vst [vmem:[%s1795_s4 + $0x160] sm:$0xff] %v810_v52  ;;  %v621_v48 = vadd.f32 %v1277_v41, %v556_v44 }
 0x1aa   :  { %v795_v55 = vmax.f32 %v731_v51, 0.0  ;;  %890 = vst [vmem:[%s1795_s4 + $0x1e0] sm:$0xff] %v826_v53  ;;  %v637_v40 = vadd.f32 %v1277_v41, %v572_v45 }
 0x1b1   :  { %v683_v62 = vld [vmem:[%s1794_s3 + $0x168] sm:$0xff] }
 0x1b2   :  { %v699_v63 = vld [vmem:[%s1794_s3 + $0x1e8] sm:$0xff]  ;;  %v747_v8 = vadd.f32 %v683_v62, %v619_v2 }
 0x1b3   :  { %843 = vst [vmem:[%s1795_s4 + $0x68] sm:$0xff] %v779_v54  ;;  %v763_v9 = vadd.f32 %v699_v63, %v635_v3 }
 0x1b4   :  { %v811_v12 = vmax.f32 %v747_v8, 0.0 }
 0x1b5   :  { %v827_v13 = vmax.f32 %v763_v9, 0.0 }
 0x1ba   :  { %v652_v4 = vld [vmem:[%s1794_s3 + $0x70] sm:$0xff] }
 0x1bb   :  { %v668_v5 = vld [vmem:[%s1794_s3 + $0xf0] sm:$0xff]  ;;  %v716_v10 = vadd.f32 %v652_v4, %v588_v6 }
 0x1bc   :  { %859 = vst [vmem:[%s1795_s4 + $0xe8] sm:$0xff] %v795_v55  ;;  %v732_v11 = vadd.f32 %v668_v5, %v604_v7 }
 0x1bd   :  { %v780_v14 = vmax.f32 %v716_v10, 0.0  ;;  %875 = vst [vmem:[%s1795_s4 + $0x168] sm:$0xff] %v811_v12 }
 0x1be   :  { %v796_v15 = vmax.f32 %v732_v11, 0.0  ;;  %891 = vst [vmem:[%s1795_s4 + $0x1e8] sm:$0xff] %v827_v13 }
 0x1c5   :  { %v684_v22 = vld [vmem:[%s1794_s3 + $0x170] sm:$0xff] }
 0x1c6   :  { %v700_v23 = vld [vmem:[%s1794_s3 + $0x1f0] sm:$0xff]  ;;  %v748_v32 = vadd.f32 %v684_v22, %v620_v26 }
 0x1c7   :  { %844 = vst [vmem:[%s1795_s4 + $0x70] sm:$0xff] %v780_v14  ;;  %v764_v33 = vadd.f32 %v700_v23, %v636_v27 }
 0x1c8   :  { %v812_v36 = vmax.f32 %v748_v32, 0.0 }
 0x1c9   :  { %v828_v37 = vmax.f32 %v764_v33, 0.0 }
 0x1ce   :  { %v653_v28 = vld [vmem:[%s1794_s3 + $0x78] sm:$0xff] }
 0x1cf   :  { %v669_v29 = vld [vmem:[%s1794_s3 + $0xf8] sm:$0xff]  ;;  %v717_v34 = vadd.f32 %v653_v28, %v589_v30 }
 0x1d0   :  { %860 = vst [vmem:[%s1795_s4 + $0xf0] sm:$0xff] %v796_v15  ;;  %v733_v35 = vadd.f32 %v669_v29, %v605_v31 }
 0x1d1   :  { %v781_v38 = vmax.f32 %v717_v34, 0.0  ;;  %876 = vst [vmem:[%s1795_s4 + $0x170] sm:$0xff] %v812_v36 }
 0x1d2   :  { %v797_v39 = vmax.f32 %v733_v35, 0.0  ;;  %892 = vst [vmem:[%s1795_s4 + $0x1f0] sm:$0xff] %v828_v37 }
 0x1d9   :  { %v685_v46 = vld [vmem:[%s1794_s3 + $0x178] sm:$0xff] }
 0x1da   :  { %v701_v47 = vld [vmem:[%s1794_s3 + $0x1f8] sm:$0xff]  ;;  %v749_v49 = vadd.f32 %v685_v46, %v621_v48 }
 0x1db   :  { %845 = vst [vmem:[%s1795_s4 + $0x78] sm:$0xff] %v781_v38  ;;  %v765_v50 = vadd.f32 %v701_v47, %v637_v40 }
 0x1dc   :  { %861 = vst [vmem:[%s1795_s4 + $0xf8] sm:$0xff] %v797_v39  ;;  %v813_v51 = vmax.f32 %v749_v49, 0.0 }
 0x1dd   :  { %v829_v52 = vmax.f32 %v765_v50, 0.0 }
 0x1de   :  { %877 = vst [vmem:[%s1795_s4 + $0x178] sm:$0xff] %v813_v51 }
 0x1df   :  { %893 = vst [vmem:[%s1795_s4 + $0x1f8] sm:$0xff] %v829_v52 }

</bundles_post_ra>
